<compile_context>
chip_gen: v5e
topology: v5e:2x2
jax: 0.10.0
libtpu: 0.0.40
codegen_flags: <defaults>
</compile_context>

<pallas_src>
import functools

import jax
import jax.numpy as jnp
from jax import lax
from jax.experimental import pallas as pl
from jax.experimental.pallas import tpu as pltpu


_MAX_TM = 1024                      # lane-tile cap (big tiles for v5e/v6e large-M)
_VMEM_LIMIT = 32 * 1024 * 1024      # per-step footprint is far smaller on all gens


def _round_up(v, m):
    return (v + m - 1) // m * m


def _pick_tm(m):
    """Output-column tile: lane-dense (multiple of 128) and, whenever M needs more
    than one 128-lane tile, at least two grid steps (v7x megacore sharding and
    input/output pipelining), capped at _MAX_TM so big-M layers still amortize the
    per-grid-step overhead on single-TC chips."""
    m128 = _round_up(max(m, 1), 128)
    if m128 <= 128:
        return 128
    return max(128, min(_MAX_TM, _round_up(m128 // 2, 128)))


# -----------------------------------------------------------------------------
# Pallas kernel: lane-dense fused conv-as-matmul (bias + ReLU + folded eval BN)
# -----------------------------------------------------------------------------
def _fused_conv_mm_kernel(w_ref, p_ref, meta_ref, o_ref, *, apply_relu, apply_bn):
    # MXU: (Cop, Kp) @ (Kp, TM), f32 accumulation; epilogue stays f32 (v5e: no bf16 VPU).
    acc = jnp.dot(w_ref[...], p_ref[...], preferred_element_type=jnp.float32)
    acc = acc + meta_ref[0]                       # bias   (Cop, 1) broadcast over lanes
    if apply_relu:
        acc = jnp.maximum(acc, 0.0)
    if apply_bn:
        acc = acc * meta_ref[1] + meta_ref[2]     # folded eval-mode BatchNorm affine
    o_ref[...] = acc


def _fused_conv_matmul(w_p, patches_p, meta, apply_relu, apply_bn, tm):
    """w_p: (Cop, Kp), patches_p: (Kp, Mp) (MXU dtype), meta: (3, Cop, 1) f32.
    Returns (Cop, Mp) f32 = epilogue(w_p @ patches_p)."""
    Cop, Kp = w_p.shape
    _, Mp = patches_p.shape
    ibytes = patches_p.dtype.itemsize
    kernel = functools.partial(_fused_conv_mm_kernel,
                               apply_relu=apply_relu, apply_bn=apply_bn)
    return pl.pallas_call(
        kernel,
        out_shape=jax.ShapeDtypeStruct((Cop, Mp), jnp.float32),
        grid_spec=pltpu.PrefetchScalarGridSpec(
            num_scalar_prefetch=0,
            grid=(Mp // tm,),
            in_specs=[
                pl.BlockSpec((Cop, Kp), lambda i: (0, 0)),        # weights stay resident
                pl.BlockSpec((Kp, tm), lambda i: (0, i)),         # streamed patch tiles
                pl.BlockSpec((3, Cop, 1), lambda i: (0, 0, 0)),   # packed bias/scale/shift
            ],
            out_specs=pl.BlockSpec((Cop, tm), lambda i: (0, i)),
        ),
        compiler_params=pltpu.CompilerParams(
            dimension_semantics=("parallel",),
            vmem_limit_bytes=_VMEM_LIMIT),
        cost_estimate=pl.CostEstimate(
            flops=2 * Mp * Kp * Cop,
            transcendentals=0,
            bytes_accessed=ibytes * (Kp * Mp + Cop * Kp) + 4 * (3 * Cop + Cop * Mp)),
    )(w_p, patches_p, meta)


# -----------------------------------------------------------------------------
# Conv2d layer (channel-major), patch slab emitted directly in (Kp, Mp)
# -----------------------------------------------------------------------------
def conv2d_layer(x, w, b, bn_scale, bn_shift, stride, apply_relu, apply_bn,
                 prescale=None, compute_dtype=jnp.bfloat16):
    """VALID Conv2d + bias [+ ReLU] [+ folded eval-mode BN].

    x: channel-major (Ci, N, H, W); returns channel-major (Co, N, OH, OW), f32.
    w: (Co, Ci, kh, kw) PyTorch Conv2d layout.
    prescale: optional (mean, scale) broadcast over the last (bins) axis, fused
    into the patch build (no extra HBM pass over the activation).
    """
    Co, Ci, kh, kw = w.shape
    sh, sw = stride
    if prescale is not None:
        mean, scale = prescale
        x = (x + mean) * scale
    C, N, H, W = x.shape
    OH = (H - kh) // sh + 1
    OW = (W - kw) // sw + 1
    M = N * OH * OW
    K = C * kh * kw

    tm = _pick_tm(M)
    Mp = _round_up(M, tm)
    kpack = 16 if compute_dtype == jnp.bfloat16 else 8
    Kp = _round_up(K, kpack)
    Cop = _round_up(Co, 8)

    # Padded, lane-dense (Kp, Mp) patch slab emitted in one concatenate, already in
    # the MXU compute dtype.  K ordering is tap-major: row = (i*kw + j)*C + ci.
    taps = []
    for i in range(kh):
        for j in range(kw):
            sl = lax.slice(x, (0, 0, i, j),
                           (C, N, i + (OH - 1) * sh + 1, j + (OW - 1) * sw + 1),
                           (1, 1, sh, sw))                       # (C, N, OH, OW)
            sl = sl.reshape(C, M).astype(compute_dtype)
            taps.append(jnp.pad(sl, ((0, 0), (0, Mp - M))))
    if Kp > K:
        taps.append(jnp.zeros((Kp - K, Mp), compute_dtype))
    patches_p = jnp.concatenate(taps, axis=0)

    # Weights reordered to the tap-major K layout, padded, cast to the MXU dtype.
    w2d = jnp.transpose(w, (0, 2, 3, 1)).reshape(Co, K)
    w_p = jnp.pad(w2d, ((0, Cop - Co), (0, Kp - K))).astype(compute_dtype)

    # Packed per-channel epilogue operand (bias / BN scale / BN shift), f32.
    meta = jnp.stack([
        jnp.pad(b, (0, Cop - Co)),
        jnp.pad(bn_scale, (0, Cop - Co)),
        jnp.pad(bn_shift, (0, Cop - Co)),
    ]).reshape(3, Cop, 1)

    out2d = _fused_conv_matmul(w_p, patches_p, meta, apply_relu, apply_bn, tm)
    return out2d[:Co, :M].reshape(Co, N, OH, OW)


# -----------------------------------------------------------------------------
# ConvTranspose2d layer via sub-pixel phase decomposition + reshape interleave
# -----------------------------------------------------------------------------
def conv_transpose2d_layer(x, w, b, bn_scale, bn_shift, stride, out_pad,
                           apply_relu, apply_bn, compute_dtype=jnp.bfloat16):
    """ConvTranspose2d(padding=0, output_padding=out_pad) [+ ReLU] [+ eval BN].

    x: channel-major (Ci, N, H, W); w: (Ci, Co, kh, kw) PyTorch layout.
    One small VALID correlation per active output phase (batched along channels
    into a single Pallas matmul); the output is assembled by a reshape/transpose
    interleave of the phase outputs with per-channel fill blocks for the stride
    holes (no strided scatters, no full-output pre-fill).
    """
    Ci, Co, KH, KW = w.shape
    sh, sw = stride
    oph, opw = out_pad
    _, N, H, W = x.shape
    OH = (H - 1) * sh + KH + oph
    OW = (W - 1) * sw + KW + opw

    # Active phases (those reached by at least one kernel tap).
    ph = list(range(min(sh, KH)))
    pw = list(range(min(sw, KW)))
    A0 = -(-(KH - ph[0]) // sh)
    B0 = -(-(KW - pw[0]) // sw)
    # For 3x3 kernels with strides {1,3,5} every active phase shares one footprint,
    # so all phases batch into one Pallas matmul along the channel axis.
    assert all(-(-(KH - p) // sh) == A0 for p in ph)
    assert all(-(-(KW - q) // sw) == B0 for q in pw)
    nh, nw = len(ph), len(pw)
    nph = nh * nw

    Mh = -(-OH // sh)                 # rows per phase
    Mw = -(-OW // sw)                 # cols per phase
    xp = jnp.pad(x, ((0, 0), (0, 0), (A0 - 1, Mh - H), (B0 - 1, Mw - W)))

    # Batched equivalent correlation weights: (nph*Co, Ci, A0, B0).
    taps = []
    for p in ph:
        for q in pw:
            sub = w[:, :, p::sh, q::sw][:, :, ::-1, ::-1]        # (Ci, Co, A0, B0)
            taps.append(jnp.transpose(sub, (1, 0, 2, 3)))        # (Co, Ci, A0, B0)
    w_eq = jnp.concatenate(taps, axis=0)
    b_all = jnp.tile(b, nph)
    s_all = jnp.tile(bn_scale, nph)
    t_all = jnp.tile(bn_shift, nph)

    po = conv2d_layer(xp, w_eq, b_all, s_all, t_all, (1, 1),
                      apply_relu, apply_bn,
                      compute_dtype=compute_dtype)               # (nph*Co, N, Mh, Mw)

    # Stride holes (output rows/cols reached by no tap, incl. output_padding tails
    # beyond the last tap) are bias-only through the same epilogue.
    fill = b
    if apply_relu:
        fill = jnp.maximum(fill, 0.0)
    if apply_bn:
        fill = fill * bn_scale + bn_shift

    po = po.reshape(nh, nw, Co, N, Mh, Mw)
    po = jnp.transpose(po, (2, 3, 4, 0, 5, 1))                   # (Co, N, Mh, nh, Mw, nw)
    if nh < sh:
        fb = jnp.broadcast_to(fill[:, None, None, None, None, None],
                              (Co, N, Mh, sh - nh, Mw, nw))
        po = jnp.concatenate([po, fb], axis=3)
    if nw < sw:
        fb = jnp.broadcast_to(fill[:, None, None, None, None, None],
                              (Co, N, Mh, sh, Mw, sw - nw))
        po = jnp.concatenate([po, fb], axis=5)
    out = po.reshape(Co, N, Mh * sh, Mw * sw)[:, :, :OH, :OW]
    return out


# -----------------------------------------------------------------------------
# Model definition (matches OpenUnmix.__init__ with nb_channels=2)
# -----------------------------------------------------------------------------
ENC_CFG = [  # (Cin, Cout, stride)
    (2, 12, (5, 3)),
    (12, 20, (5, 1)),
    (20, 30, (1, 1)),
    (30, 40, (1, 1)),
]
DEC_CFG = [  # (Cin, Cout, stride, output_padding, has_relu_and_bn)
    (40, 30, (1, 1), (0, 0), True),
    (30, 20, (1, 1), (0, 0), True),
    (20, 12, (5, 1), (4, 0), True),
    (12, 2, (5, 3), (4, 2), False),
]
_BN_EPS = 1e-5


def init_params(key, nb_bins):
    keys = iter(jax.random.split(key, 64))
    params = {}
    # these are the *stored* parameters (the module stores -mean and 1/scale)
    params['input_mean'] = 0.1 * jax.random.normal(next(keys), (nb_bins,), jnp.float32)
    params['input_scale'] = jax.random.uniform(next(keys), (nb_bins,), jnp.float32, 0.5, 1.5)

    def bn_fold(c):
        gamma = jax.random.uniform(next(keys), (c,), jnp.float32, 0.5, 1.5)
        beta = 0.1 * jax.random.normal(next(keys), (c,), jnp.float32)
        r_mean = 0.1 * jax.random.normal(next(keys), (c,), jnp.float32)
        r_var = jax.random.uniform(next(keys), (c,), jnp.float32, 0.5, 1.5)
        scale = gamma / jnp.sqrt(r_var + _BN_EPS)
        shift = beta - r_mean * scale
        return scale, shift

    enc = []
    for (ci, co, _s) in ENC_CFG:
        w = jax.random.normal(next(keys), (co, ci, 3, 3), jnp.float32) / jnp.sqrt(ci * 9.0)
        b = 0.05 * jax.random.normal(next(keys), (co,), jnp.float32)
        s, t = bn_fold(co)
        enc.append((w, b, s, t))
    dec = []
    for (ci, co, _s, _op, has_bn) in DEC_CFG:
        w = jax.random.normal(next(keys), (ci, co, 3, 3), jnp.float32) / jnp.sqrt(ci * 9.0)
        b = 0.05 * jax.random.normal(next(keys), (co,), jnp.float32)
        if has_bn:
            s, t = bn_fold(co)
        else:
            s = jnp.ones((co,), jnp.float32)
            t = jnp.zeros((co,), jnp.float32)
        dec.append((w, b, s, t))
    params['encoder'] = enc
    params['decoder'] = dec
    return params


def openunmix_forward(x, params, compute_dtype=jnp.bfloat16):
    """x: (nb_samples, nb_channels, nb_bins, nb_frames) -> same-shaped output."""
    # single entry transpose into the channel-major internal layout (C, N, frames, bins)
    h = jnp.transpose(x, (1, 0, 3, 2))

    enc = params['encoder']
    # (x + input_mean) * input_scale fused into the first conv's patch build
    w, b, s, t = enc[0]
    h = conv2d_layer(h, w, b, s, t, ENC_CFG[0][2], True, True,
                     prescale=(params['input_mean'], params['input_scale']),
                     compute_dtype=compute_dtype)
    for (w, b, s, t), (_ci, _co, stride) in zip(enc[1:], ENC_CFG[1:]):
        h = conv2d_layer(h, w, b, s, t, stride, True, True,
                         compute_dtype=compute_dtype)

    for (w, b, s, t), (_ci, _co, stride, opad, has_bn) in zip(params['decoder'], DEC_CFG):
        h = conv_transpose2d_layer(h, w, b, s, t, stride, opad, has_bn, has_bn,
                                   compute_dtype=compute_dtype)

    # single exit transpose back to (N, C, nb_bins, nb_frames)
    return jnp.transpose(h, (1, 0, 3, 2))


# -----------------------------------------------------------------------------
# Pure-XLA reference (no Pallas) for a numerical sanity check.  compute_dtype
# controls the conv-operand dtype so the bf16 kernel path can be checked against
# a reference with *identical* MXU operands (tight structural check).
# -----------------------------------------------------------------------------
def reference_forward(x, params, compute_dtype=jnp.float32):
    dn = ('NCHW', 'OIHW', 'NCHW')
    prec = (lax.Precision.HIGHEST if compute_dtype == jnp.float32
            else lax.Precision.DEFAULT)

    def conv(h, w, **kw):
        return lax.conv_general_dilated(
            h.astype(compute_dtype), w.astype(compute_dtype),
            dimension_numbers=dn, preferred_element_type=jnp.float32,
            precision=prec, **kw)

    h = jnp.transpose(x, (0, 1, 3, 2))
    h = (h + params['input_mean']) * params['input_scale']
    for (w, b, s, t), (_ci, _co, stride) in zip(params['encoder'], ENC_CFG):
        h = conv(h, w, window_strides=stride, padding='VALID')
        h = h + b[None, :, None, None]
        h = jnp.maximum(h, 0.0)
        h = h * s[None, :, None, None] + t[None, :, None, None]
    for (w, b, s, t), (_ci, _co, stride, opad, has_bn) in zip(params['decoder'], DEC_CFG):
        w_eq = jnp.transpose(w[:, :, ::-1, ::-1], (1, 0, 2, 3))
        h = conv(h, w_eq, window_strides=(1, 1),
                 padding=[(2, 2 + opad[0]), (2, 2 + opad[1])],
                 lhs_dilation=stride)
        h = h + b[None, :, None, None]
        if has_bn:
            h = jnp.maximum(h, 0.0)
            h = h * s[None, :, None, None] + t[None, :, None, None]
    return jnp.transpose(h, (0, 1, 3, 2))


if __name__ == "__main__":
    nb_samples, nb_channels = 2, 2
    # smallest sizes for which the decoder exactly restores the input shape:
    # nb_bins ≡ 2 (mod 3), nb_frames = 25*m + 12 with m >= 5
    nb_bins, nb_frames = 23, 137

    key = jax.random.PRNGKey(0)
    k_x, k_p = jax.random.split(key)
    x = jnp.abs(jax.random.normal(
        k_x, (nb_samples, nb_channels, nb_bins, nb_frames), jnp.float32))
    params = init_params(k_p, nb_bins)

    # Production path: bf16 MXU operands, f32 accumulation/epilogue.
    fwd_bf16 = jax.jit(functools.partial(openunmix_forward, compute_dtype=jnp.bfloat16))
    out = jax.block_until_ready(fwd_bf16(x, params))
    assert out.shape == (nb_samples, nb_channels, nb_bins, nb_frames), out.shape
    assert bool(jnp.all(jnp.isfinite(out)))

    # Tight structural check: same (bf16) operands in kernel and XLA reference,
    # so only f32 summation-order differences remain.
    ref_b = jax.block_until_ready(
        jax.jit(functools.partial(reference_forward, compute_dtype=jnp.bfloat16))(x, params))
    err_b = float(jnp.max(jnp.abs(out - ref_b)) / (jnp.max(jnp.abs(ref_b)) + 1e-8))
    assert err_b < 5e-4, f"bf16-path mismatch vs matched reference: rel err {err_b}"

    # Full-precision path check (f32 operands) against an all-f32 HIGHEST reference.
    # Tolerance kept at 1e-3 only because the in-kernel f32 matmul may use the
    # MXU's multi-pass f32 path; the matched-dtype check above is the tight one.
    out32 = jax.block_until_ready(
        jax.jit(functools.partial(openunmix_forward, compute_dtype=jnp.float32))(x, params))
    ref_f = jax.block_until_ready(
        jax.jit(functools.partial(reference_forward, compute_dtype=jnp.float32))(x, params))
    err_f = float(jnp.max(jnp.abs(out32 - ref_f)) / (jnp.max(jnp.abs(ref_f)) + 1e-8))
    assert err_f < 1e-3, f"f32-path mismatch vs reference: rel err {err_f}"

    print("KERNEL_OK")
</pallas_src>

<mosaic_0001>
module attributes {stable_mosaic.version = 11 : i64} {
  func.func @_fused_conv_mm_kernel(%arg0: i32, %arg1: memref<16x32xbf16, #tpu.memory_space<vmem>>, %arg2: memref<32x256xbf16, #tpu.memory_space<vmem>>, %arg3: memref<3x16x1xf32, #tpu.memory_space<vmem>>, %arg4: memref<16x256xf32, #tpu.memory_space<vmem>>) attributes {dimension_semantics = [#tpu.dimension_semantics<parallel>], iteration_bounds = array<i64: 2>, scalar_prefetch = 0 : i64, scratch_operands = 0 : i64, tpu.core_type = #tpu.core_type<tc>, window_params = [{pipeline_mode = #tpu.pipeline_mode<synchronous>, transform_indices = @transform_0, window_bounds = array<i64: 16, 32>}, {transform_indices = @transform_1, window_bounds = array<i64: 32, 256>}, {pipeline_mode = #tpu.pipeline_mode<synchronous>, transform_indices = @transform_2, window_bounds = array<i64: 3, 16, 1>}, {transform_indices = @transform_3, window_bounds = array<i64: 16, 256>}]} {
    %c0 = arith.constant 0 : index
    %c0_0 = arith.constant 0 : index
    %0 = vector.load %arg1[%c0, %c0_0] : memref<16x32xbf16, #tpu.memory_space<vmem>>, vector<16x32xbf16>
    %c0_1 = arith.constant 0 : index
    %c0_2 = arith.constant 0 : index
    %1 = vector.load %arg2[%c0_1, %c0_2] : memref<32x256xbf16, #tpu.memory_space<vmem>>, vector<32x256xbf16>
    %cst = arith.constant dense<0.000000e+00> : vector<16x256xf32>
    %2 = tpu.matmul %0, %1, %cst {dimension_numbers = #tpu.dot_dimension_numbers<[1], [0], [0], [1], [0, 0, 1, 1], [], []>} : vector<16x32xbf16>, vector<32x256xbf16>, vector<16x256xf32> -> vector<16x256xf32>
    %c0_3 = arith.constant 0 : index
    %c0_4 = arith.constant 0 : index
    %c0_5 = arith.constant 0 : index
    %3 = vector.load %arg3[%c0_3, %c0_4, %c0_5] : memref<3x16x1xf32, #tpu.memory_space<vmem>>, vector<1x16x1xf32>
    %4 = vector.shape_cast %3 : vector<1x16x1xf32> to vector<16x1xf32>
    %5 = vector.broadcast %4 : vector<16x1xf32> to vector<16x256xf32>
    %6 = arith.addf %2, %5 : vector<16x256xf32>
    %cst_6 = arith.constant 0.000000e+00 : f32
    %7 = vector.broadcast %cst_6 : f32 to vector<16x256xf32>
    %8 = arith.maximumf %6, %7 : vector<16x256xf32>
    %c1 = arith.constant 1 : index
    %c0_7 = arith.constant 0 : index
    %c0_8 = arith.constant 0 : index
    %9 = vector.load %arg3[%c1, %c0_7, %c0_8] : memref<3x16x1xf32, #tpu.memory_space<vmem>>, vector<1x16x1xf32>
    %10 = vector.shape_cast %9 : vector<1x16x1xf32> to vector<16x1xf32>
    %11 = vector.broadcast %10 : vector<16x1xf32> to vector<16x256xf32>
    %12 = arith.mulf %8, %11 : vector<16x256xf32>
    %c2 = arith.constant 2 : index
    %c0_9 = arith.constant 0 : index
    %c0_10 = arith.constant 0 : index
    %13 = vector.load %arg3[%c2, %c0_9, %c0_10] : memref<3x16x1xf32, #tpu.memory_space<vmem>>, vector<1x16x1xf32>
    %14 = vector.shape_cast %13 : vector<1x16x1xf32> to vector<16x1xf32>
    %15 = vector.broadcast %14 : vector<16x1xf32> to vector<16x256xf32>
    %16 = arith.addf %12, %15 : vector<16x256xf32>
    %c0_11 = arith.constant 0 : index
    %c0_12 = arith.constant 0 : index
    %17 = vector.load %arg4[%c0_11, %c0_12] : memref<16x256xf32, #tpu.memory_space<vmem>>, vector<16x256xf32>
    tpu.vector_store %arg4[%c0_11, %c0_12], %16 {strides = array<i32>} : memref<16x256xf32, #tpu.memory_space<vmem>>, vector<16x256xf32>,
    return
  }
  func.func @transform_0(%arg0: i32) -> (i32, i32) {
    %c0_i32 = arith.constant 0 : i32
    %c0_i32_0 = arith.constant 0 : i32
    %c0_i32_1 = arith.constant 0 : i32
    return %c0_i32, %c0_i32_0 : i32, i32
  }
  func.func @transform_1(%arg0: i32) -> (i32, i32) {
    %c0_i32 = arith.constant 0 : i32
    %c0_i32_0 = arith.constant 0 : i32
    return %c0_i32, %arg0 : i32, i32
  }
  func.func @transform_2(%arg0: i32) -> (i32, i32, i32) {
    %c0_i32 = arith.constant 0 : i32
    %c0_i32_0 = arith.constant 0 : i32
    %c0_i32_1 = arith.constant 0 : i32
    %c0_i32_2 = arith.constant 0 : i32
    return %c0_i32, %c0_i32_0, %c0_i32_1 : i32, i32, i32
  }
  func.func @transform_3(%arg0: i32) -> (i32, i32) {
    %c0_i32 = arith.constant 0 : i32
    %c0_i32_0 = arith.constant 0 : i32
    return %c0_i32, %arg0 : i32, i32
  }
}

module attributes {stable_mosaic.version = 11 : i64} {
  func.func @_fused_conv_mm_kernel(%arg0: i32, %arg1: memref<24x112xbf16, #tpu.memory_space<vmem>>, %arg2: memref<112x128xbf16, #tpu.memory_space<vmem>>, %arg3: memref<3x24x1xf32, #tpu.memory_space<vmem>>, %arg4: memref<24x128xf32, #tpu.memory_space<vmem>>) attributes {dimension_semantics = [#tpu.dimension_semantics<parallel>], iteration_bounds = array<i64: 1>, scalar_prefetch = 0 : i64, scratch_operands = 0 : i64, tpu.core_type = #tpu.core_type<tc>, window_params = [{pipeline_mode = #tpu.pipeline_mode<synchronous>, transform_indices = @transform_0, window_bounds = array<i64: 24, 112>}, {transform_indices = @transform_1, window_bounds = array<i64: 112, 128>}, {pipeline_mode = #tpu.pipeline_mode<synchronous>, transform_indices = @transform_2, window_bounds = array<i64: 3, 24, 1>}, {transform_indices = @transform_3, window_bounds = array<i64: 24, 128>}]} {
    %c0 = arith.constant 0 : index
    %c0_0 = arith.constant 0 : index
    %0 = vector.load %arg1[%c0, %c0_0] : memref<24x112xbf16, #tpu.memory_space<vmem>>, vector<24x112xbf16>
    %c0_1 = arith.constant 0 : index
    %c0_2 = arith.constant 0 : index
    %1 = vector.load %arg2[%c0_1, %c0_2] : memref<112x128xbf16, #tpu.memory_space<vmem>>, vector<112x128xbf16>
    %cst = arith.constant dense<0.000000e+00> : vector<24x128xf32>
    %2 = tpu.matmul %0, %1, %cst {dimension_numbers = #tpu.dot_dimension_numbers<[1], [0], [0], [1], [0, 0, 1, 1], [], []>} : vector<24x112xbf16>, vector<112x128xbf16>, vector<24x128xf32> -> vector<24x128xf32>
    %c0_3 = arith.constant 0 : index
    %c0_4 = arith.constant 0 : index
    %c0_5 = arith.constant 0 : index
    %3 = vector.load %arg3[%c0_3, %c0_4, %c0_5] : memref<3x24x1xf32, #tpu.memory_space<vmem>>, vector<1x24x1xf32>
    %4 = vector.shape_cast %3 : vector<1x24x1xf32> to vector<24x1xf32>
    %5 = vector.broadcast %4 : vector<24x1xf32> to vector<24x128xf32>
    %6 = arith.addf %2, %5 : vector<24x128xf32>
    %cst_6 = arith.constant 0.000000e+00 : f32
    %7 = vector.broadcast %cst_6 : f32 to vector<24x128xf32>
    %8 = arith.maximumf %6, %7 : vector<24x128xf32>
    %c1 = arith.constant 1 : index
    %c0_7 = arith.constant 0 : index
    %c0_8 = arith.constant 0 : index
    %9 = vector.load %arg3[%c1, %c0_7, %c0_8] : memref<3x24x1xf32, #tpu.memory_space<vmem>>, vector<1x24x1xf32>
    %10 = vector.shape_cast %9 : vector<1x24x1xf32> to vector<24x1xf32>
    %11 = vector.broadcast %10 : vector<24x1xf32> to vector<24x128xf32>
    %12 = arith.mulf %8, %11 : vector<24x128xf32>
    %c2 = arith.constant 2 : index
    %c0_9 = arith.constant 0 : index
    %c0_10 = arith.constant 0 : index
    %13 = vector.load %arg3[%c2, %c0_9, %c0_10] : memref<3x24x1xf32, #tpu.memory_space<vmem>>, vector<1x24x1xf32>
    %14 = vector.shape_cast %13 : vector<1x24x1xf32> to vector<24x1xf32>
    %15 = vector.broadcast %14 : vector<24x1xf32> to vector<24x128xf32>
    %16 = arith.addf %12, %15 : vector<24x128xf32>
    %c0_11 = arith.constant 0 : index
    %c0_12 = arith.constant 0 : index
    %17 = vector.load %arg4[%c0_11, %c0_12] : memref<24x128xf32, #tpu.memory_space<vmem>>, vector<24x128xf32>
    tpu.vector_store %arg4[%c0_11, %c0_12], %16 {strides = array<i32>} : memref<24x128xf32, #tpu.memory_space<vmem>>, vector<24x128xf32>,
    return
  }
  func.func @transform_0(%arg0: i32) -> (i32, i32) {
    %c0_i32 = arith.constant 0 : i32
    %c0_i32_0 = arith.constant 0 : i32
    %c0_i32_1 = arith.constant 0 : i32
    return %c0_i32, %c0_i32_0 : i32, i32
  }
  func.func @transform_1(%arg0: i32) -> (i32, i32) {
    %c0_i32 = arith.constant 0 : i32
    %c0_i32_0 = arith.constant 0 : i32
    return %c0_i32, %arg0 : i32, i32
  }
  func.func @transform_2(%arg0: i32) -> (i32, i32, i32) {
    %c0_i32 = arith.constant 0 : i32
    %c0_i32_0 = arith.constant 0 : i32
    %c0_i32_1 = arith.constant 0 : i32
    %c0_i32_2 = arith.constant 0 : i32
    return %c0_i32, %c0_i32_0, %c0_i32_1 : i32, i32, i32
  }
  func.func @transform_3(%arg0: i32) -> (i32, i32) {
    %c0_i32 = arith.constant 0 : i32
    %c0_i32_0 = arith.constant 0 : i32
    return %c0_i32, %arg0 : i32, i32
  }
}

module attributes {stable_mosaic.version = 11 : i64} {
  func.func @_fused_conv_mm_kernel(%arg0: i32, %arg1: memref<32x192xbf16, #tpu.memory_space<vmem>>, %arg2: memref<192x128xbf16, #tpu.memory_space<vmem>>, %arg3: memref<3x32x1xf32, #tpu.memory_space<vmem>>, %arg4: memref<32x128xf32, #tpu.memory_space<vmem>>) attributes {dimension_semantics = [#tpu.dimension_semantics<parallel>], iteration_bounds = array<i64: 1>, scalar_prefetch = 0 : i64, scratch_operands = 0 : i64, tpu.core_type = #tpu.core_type<tc>, window_params = [{pipeline_mode = #tpu.pipeline_mode<synchronous>, transform_indices = @transform_0, window_bounds = array<i64: 32, 192>}, {transform_indices = @transform_1, window_bounds = array<i64: 192, 128>}, {pipeline_mode = #tpu.pipeline_mode<synchronous>, transform_indices = @transform_2, window_bounds = array<i64: 3, 32, 1>}, {transform_indices = @transform_3, window_bounds = array<i64: 32, 128>}]} {
    %c0 = arith.constant 0 : index
    %c0_0 = arith.constant 0 : index
    %0 = vector.load %arg1[%c0, %c0_0] : memref<32x192xbf16, #tpu.memory_space<vmem>>, vector<32x192xbf16>
    %c0_1 = arith.constant 0 : index
    %c0_2 = arith.constant 0 : index
    %1 = vector.load %arg2[%c0_1, %c0_2] : memref<192x128xbf16, #tpu.memory_space<vmem>>, vector<192x128xbf16>
    %cst = arith.constant dense<0.000000e+00> : vector<32x128xf32>
    %2 = tpu.matmul %0, %1, %cst {dimension_numbers = #tpu.dot_dimension_numbers<[1], [0], [0], [1], [0, 0, 1, 1], [], []>} : vector<32x192xbf16>, vector<192x128xbf16>, vector<32x128xf32> -> vector<32x128xf32>
    %c0_3 = arith.constant 0 : index
    %c0_4 = arith.constant 0 : index
    %c0_5 = arith.constant 0 : index
    %3 = vector.load %arg3[%c0_3, %c0_4, %c0_5] : memref<3x32x1xf32, #tpu.memory_space<vmem>>, vector<1x32x1xf32>
    %4 = vector.shape_cast %3 : vector<1x32x1xf32> to vector<32x1xf32>
    %5 = vector.broadcast %4 : vector<32x1xf32> to vector<32x128xf32>
    %6 = arith.addf %2, %5 : vector<32x128xf32>
    %cst_6 = arith.constant 0.000000e+00 : f32
    %7 = vector.broadcast %cst_6 : f32 to vector<32x128xf32>
    %8 = arith.maximumf %6, %7 : vector<32x128xf32>
    %c1 = arith.constant 1 : index
    %c0_7 = arith.constant 0 : index
    %c0_8 = arith.constant 0 : index
    %9 = vector.load %arg3[%c1, %c0_7, %c0_8] : memref<3x32x1xf32, #tpu.memory_space<vmem>>, vector<1x32x1xf32>
    %10 = vector.shape_cast %9 : vector<1x32x1xf32> to vector<32x1xf32>
    %11 = vector.broadcast %10 : vector<32x1xf32> to vector<32x128xf32>
    %12 = arith.mulf %8, %11 : vector<32x128xf32>
    %c2 = arith.constant 2 : index
    %c0_9 = arith.constant 0 : index
    %c0_10 = arith.constant 0 : index
    %13 = vector.load %arg3[%c2, %c0_9, %c0_10] : memref<3x32x1xf32, #tpu.memory_space<vmem>>, vector<1x32x1xf32>
    %14 = vector.shape_cast %13 : vector<1x32x1xf32> to vector<32x1xf32>
    %15 = vector.broadcast %14 : vector<32x1xf32> to vector<32x128xf32>
    %16 = arith.addf %12, %15 : vector<32x128xf32>
    %c0_11 = arith.constant 0 : index
    %c0_12 = arith.constant 0 : index
    %17 = vector.load %arg4[%c0_11, %c0_12] : memref<32x128xf32, #tpu.memory_space<vmem>>, vector<32x128xf32>
    tpu.vector_store %arg4[%c0_11, %c0_12], %16 {strides = array<i32>} : memref<32x128xf32, #tpu.memory_space<vmem>>, vector<32x128xf32>,
    return
  }
  func.func @transform_0(%arg0: i32) -> (i32, i32) {
    %c0_i32 = arith.constant 0 : i32
    %c0_i32_0 = arith.constant 0 : i32
    %c0_i32_1 = arith.constant 0 : i32
    return %c0_i32, %c0_i32_0 : i32, i32
  }
  func.func @transform_1(%arg0: i32) -> (i32, i32) {
    %c0_i32 = arith.constant 0 : i32
    %c0_i32_0 = arith.constant 0 : i32
    return %c0_i32, %arg0 : i32, i32
  }
  func.func @transform_2(%arg0: i32) -> (i32, i32, i32) {
    %c0_i32 = arith.constant 0 : i32
    %c0_i32_0 = arith.constant 0 : i32
    %c0_i32_1 = arith.constant 0 : i32
    %c0_i32_2 = arith.constant 0 : i32
    return %c0_i32, %c0_i32_0, %c0_i32_1 : i32, i32, i32
  }
  func.func @transform_3(%arg0: i32) -> (i32, i32) {
    %c0_i32 = arith.constant 0 : i32
    %c0_i32_0 = arith.constant 0 : i32
    return %c0_i32, %arg0 : i32, i32
  }
}

module attributes {stable_mosaic.version = 11 : i64} {
  func.func @_fused_conv_mm_kernel(%arg0: i32, %arg1: memref<40x272xbf16, #tpu.memory_space<vmem>>, %arg2: memref<272x128xbf16, #tpu.memory_space<vmem>>, %arg3: memref<3x40x1xf32, #tpu.memory_space<vmem>>, %arg4: memref<40x128xf32, #tpu.memory_space<vmem>>) attributes {dimension_semantics = [#tpu.dimension_semantics<parallel>], iteration_bounds = array<i64: 1>, scalar_prefetch = 0 : i64, scratch_operands = 0 : i64, tpu.core_type = #tpu.core_type<tc>, window_params = [{pipeline_mode = #tpu.pipeline_mode<synchronous>, transform_indices = @transform_0, window_bounds = array<i64: 40, 272>}, {transform_indices = @transform_1, window_bounds = array<i64: 272, 128>}, {pipeline_mode = #tpu.pipeline_mode<synchronous>, transform_indices = @transform_2, window_bounds = array<i64: 3, 40, 1>}, {transform_indices = @transform_3, window_bounds = array<i64: 40, 128>}]} {
    %c0 = arith.constant 0 : index
    %c0_0 = arith.constant 0 : index
    %0 = vector.load %arg1[%c0, %c0_0] : memref<40x272xbf16, #tpu.memory_space<vmem>>, vector<40x272xbf16>
    %c0_1 = arith.constant 0 : index
    %c0_2 = arith.constant 0 : index
    %1 = vector.load %arg2[%c0_1, %c0_2] : memref<272x128xbf16, #tpu.memory_space<vmem>>, vector<272x128xbf16>
    %cst = arith.constant dense<0.000000e+00> : vector<40x128xf32>
    %2 = tpu.matmul %0, %1, %cst {dimension_numbers = #tpu.dot_dimension_numbers<[1], [0], [0], [1], [0, 0, 1, 1], [], []>} : vector<40x272xbf16>, vector<272x128xbf16>, vector<40x128xf32> -> vector<40x128xf32>
    %c0_3 = arith.constant 0 : index
    %c0_4 = arith.constant 0 : index
    %c0_5 = arith.constant 0 : index
    %3 = vector.load %arg3[%c0_3, %c0_4, %c0_5] : memref<3x40x1xf32, #tpu.memory_space<vmem>>, vector<1x40x1xf32>
    %4 = vector.shape_cast %3 : vector<1x40x1xf32> to vector<40x1xf32>
    %5 = vector.broadcast %4 : vector<40x1xf32> to vector<40x128xf32>
    %6 = arith.addf %2, %5 : vector<40x128xf32>
    %cst_6 = arith.constant 0.000000e+00 : f32
    %7 = vector.broadcast %cst_6 : f32 to vector<40x128xf32>
    %8 = arith.maximumf %6, %7 : vector<40x128xf32>
    %c1 = arith.constant 1 : index
    %c0_7 = arith.constant 0 : index
    %c0_8 = arith.constant 0 : index
    %9 = vector.load %arg3[%c1, %c0_7, %c0_8] : memref<3x40x1xf32, #tpu.memory_space<vmem>>, vector<1x40x1xf32>
    %10 = vector.shape_cast %9 : vector<1x40x1xf32> to vector<40x1xf32>
    %11 = vector.broadcast %10 : vector<40x1xf32> to vector<40x128xf32>
    %12 = arith.mulf %8, %11 : vector<40x128xf32>
    %c2 = arith.constant 2 : index
    %c0_9 = arith.constant 0 : index
    %c0_10 = arith.constant 0 : index
    %13 = vector.load %arg3[%c2, %c0_9, %c0_10] : memref<3x40x1xf32, #tpu.memory_space<vmem>>, vector<1x40x1xf32>
    %14 = vector.shape_cast %13 : vector<1x40x1xf32> to vector<40x1xf32>
    %15 = vector.broadcast %14 : vector<40x1xf32> to vector<40x128xf32>
    %16 = arith.addf %12, %15 : vector<40x128xf32>
    %c0_11 = arith.constant 0 : index
    %c0_12 = arith.constant 0 : index
    %17 = vector.load %arg4[%c0_11, %c0_12] : memref<40x128xf32, #tpu.memory_space<vmem>>, vector<40x128xf32>
    tpu.vector_store %arg4[%c0_11, %c0_12], %16 {strides = array<i32>} : memref<40x128xf32, #tpu.memory_space<vmem>>, vector<40x128xf32>,
    return
  }
  func.func @transform_0(%arg0: i32) -> (i32, i32) {
    %c0_i32 = arith.constant 0 : i32
    %c0_i32_0 = arith.constant 0 : i32
    %c0_i32_1 = arith.constant 0 : i32
    return %c0_i32, %c0_i32_0 : i32, i32
  }
  func.func @transform_1(%arg0: i32) -> (i32, i32) {
    %c0_i32 = arith.constant 0 : i32
    %c0_i32_0 = arith.constant 0 : i32
    return %c0_i32, %arg0 : i32, i32
  }
  func.func @transform_2(%arg0: i32) -> (i32, i32, i32) {
    %c0_i32 = arith.constant 0 : i32
    %c0_i32_0 = arith.constant 0 : i32
    %c0_i32_1 = arith.constant 0 : i32
    %c0_i32_2 = arith.constant 0 : i32
    return %c0_i32, %c0_i32_0, %c0_i32_1 : i32, i32, i32
  }
  func.func @transform_3(%arg0: i32) -> (i32, i32) {
    %c0_i32 = arith.constant 0 : i32
    %c0_i32_0 = arith.constant 0 : i32
    return %c0_i32, %arg0 : i32, i32
  }
}

module attributes {stable_mosaic.version = 11 : i64} {
  func.func @_fused_conv_mm_kernel(%arg0: i32, %arg1: memref<32x368xbf16, #tpu.memory_space<vmem>>, %arg2: memref<368x128xbf16, #tpu.memory_space<vmem>>, %arg3: memref<3x32x1xf32, #tpu.memory_space<vmem>>, %arg4: memref<32x128xf32, #tpu.memory_space<vmem>>) attributes {dimension_semantics = [#tpu.dimension_semantics<parallel>], iteration_bounds = array<i64: 1>, scalar_prefetch = 0 : i64, scratch_operands = 0 : i64, tpu.core_type = #tpu.core_type<tc>, window_params = [{pipeline_mode = #tpu.pipeline_mode<synchronous>, transform_indices = @transform_0, window_bounds = array<i64: 32, 368>}, {transform_indices = @transform_1, window_bounds = array<i64: 368, 128>}, {pipeline_mode = #tpu.pipeline_mode<synchronous>, transform_indices = @transform_2, window_bounds = array<i64: 3, 32, 1>}, {transform_indices = @transform_3, window_bounds = array<i64: 32, 128>}]} {
    %c0 = arith.constant 0 : index
    %c0_0 = arith.constant 0 : index
    %0 = vector.load %arg1[%c0, %c0_0] : memref<32x368xbf16, #tpu.memory_space<vmem>>, vector<32x368xbf16>
    %c0_1 = arith.constant 0 : index
    %c0_2 = arith.constant 0 : index
    %1 = vector.load %arg2[%c0_1, %c0_2] : memref<368x128xbf16, #tpu.memory_space<vmem>>, vector<368x128xbf16>
    %cst = arith.constant dense<0.000000e+00> : vector<32x128xf32>
    %2 = tpu.matmul %0, %1, %cst {dimension_numbers = #tpu.dot_dimension_numbers<[1], [0], [0], [1], [0, 0, 1, 1], [], []>} : vector<32x368xbf16>, vector<368x128xbf16>, vector<32x128xf32> -> vector<32x128xf32>
    %c0_3 = arith.constant 0 : index
    %c0_4 = arith.constant 0 : index
    %c0_5 = arith.constant 0 : index
    %3 = vector.load %arg3[%c0_3, %c0_4, %c0_5] : memref<3x32x1xf32, #tpu.memory_space<vmem>>, vector<1x32x1xf32>
    %4 = vector.shape_cast %3 : vector<1x32x1xf32> to vector<32x1xf32>
    %5 = vector.broadcast %4 : vector<32x1xf32> to vector<32x128xf32>
    %6 = arith.addf %2, %5 : vector<32x128xf32>
    %cst_6 = arith.constant 0.000000e+00 : f32
    %7 = vector.broadcast %cst_6 : f32 to vector<32x128xf32>
    %8 = arith.maximumf %6, %7 : vector<32x128xf32>
    %c1 = arith.constant 1 : index
    %c0_7 = arith.constant 0 : index
    %c0_8 = arith.constant 0 : index
    %9 = vector.load %arg3[%c1, %c0_7, %c0_8] : memref<3x32x1xf32, #tpu.memory_space<vmem>>, vector<1x32x1xf32>
    %10 = vector.shape_cast %9 : vector<1x32x1xf32> to vector<32x1xf32>
    %11 = vector.broadcast %10 : vector<32x1xf32> to vector<32x128xf32>
    %12 = arith.mulf %8, %11 : vector<32x128xf32>
    %c2 = arith.constant 2 : index
    %c0_9 = arith.constant 0 : index
    %c0_10 = arith.constant 0 : index
    %13 = vector.load %arg3[%c2, %c0_9, %c0_10] : memref<3x32x1xf32, #tpu.memory_space<vmem>>, vector<1x32x1xf32>
    %14 = vector.shape_cast %13 : vector<1x32x1xf32> to vector<32x1xf32>
    %15 = vector.broadcast %14 : vector<32x1xf32> to vector<32x128xf32>
    %16 = arith.addf %12, %15 : vector<32x128xf32>
    %c0_11 = arith.constant 0 : index
    %c0_12 = arith.constant 0 : index
    %17 = vector.load %arg4[%c0_11, %c0_12] : memref<32x128xf32, #tpu.memory_space<vmem>>, vector<32x128xf32>
    tpu.vector_store %arg4[%c0_11, %c0_12], %16 {strides = array<i32>} : memref<32x128xf32, #tpu.memory_space<vmem>>, vector<32x128xf32>,
    return
  }
  func.func @transform_0(%arg0: i32) -> (i32, i32) {
    %c0_i32 = arith.constant 0 : i32
    %c0_i32_0 = arith.constant 0 : i32
    %c0_i32_1 = arith.constant 0 : i32
    return %c0_i32, %c0_i32_0 : i32, i32
  }
  func.func @transform_1(%arg0: i32) -> (i32, i32) {
    %c0_i32 = arith.constant 0 : i32
    %c0_i32_0 = arith.constant 0 : i32
    return %c0_i32, %arg0 : i32, i32
  }
  func.func @transform_2(%arg0: i32) -> (i32, i32, i32) {
    %c0_i32 = arith.constant 0 : i32
    %c0_i32_0 = arith.constant 0 : i32
    %c0_i32_1 = arith.constant 0 : i32
    %c0_i32_2 = arith.constant 0 : i32
    return %c0_i32, %c0_i32_0, %c0_i32_1 : i32, i32, i32
  }
  func.func @transform_3(%arg0: i32) -> (i32, i32) {
    %c0_i32 = arith.constant 0 : i32
    %c0_i32_0 = arith.constant 0 : i32
    return %c0_i32, %arg0 : i32, i32
  }
}

module attributes {stable_mosaic.version = 11 : i64} {
  func.func @_fused_conv_mm_kernel(%arg0: i32, %arg1: memref<24x272xbf16, #tpu.memory_space<vmem>>, %arg2: memref<272x128xbf16, #tpu.memory_space<vmem>>, %arg3: memref<3x24x1xf32, #tpu.memory_space<vmem>>, %arg4: memref<24x128xf32, #tpu.memory_space<vmem>>) attributes {dimension_semantics = [#tpu.dimension_semantics<parallel>], iteration_bounds = array<i64: 1>, scalar_prefetch = 0 : i64, scratch_operands = 0 : i64, tpu.core_type = #tpu.core_type<tc>, window_params = [{pipeline_mode = #tpu.pipeline_mode<synchronous>, transform_indices = @transform_0, window_bounds = array<i64: 24, 272>}, {transform_indices = @transform_1, window_bounds = array<i64: 272, 128>}, {pipeline_mode = #tpu.pipeline_mode<synchronous>, transform_indices = @transform_2, window_bounds = array<i64: 3, 24, 1>}, {transform_indices = @transform_3, window_bounds = array<i64: 24, 128>}]} {
    %c0 = arith.constant 0 : index
    %c0_0 = arith.constant 0 : index
    %0 = vector.load %arg1[%c0, %c0_0] : memref<24x272xbf16, #tpu.memory_space<vmem>>, vector<24x272xbf16>
    %c0_1 = arith.constant 0 : index
    %c0_2 = arith.constant 0 : index
    %1 = vector.load %arg2[%c0_1, %c0_2] : memref<272x128xbf16, #tpu.memory_space<vmem>>, vector<272x128xbf16>
    %cst = arith.constant dense<0.000000e+00> : vector<24x128xf32>
    %2 = tpu.matmul %0, %1, %cst {dimension_numbers = #tpu.dot_dimension_numbers<[1], [0], [0], [1], [0, 0, 1, 1], [], []>} : vector<24x272xbf16>, vector<272x128xbf16>, vector<24x128xf32> -> vector<24x128xf32>
    %c0_3 = arith.constant 0 : index
    %c0_4 = arith.constant 0 : index
    %c0_5 = arith.constant 0 : index
    %3 = vector.load %arg3[%c0_3, %c0_4, %c0_5] : memref<3x24x1xf32, #tpu.memory_space<vmem>>, vector<1x24x1xf32>
    %4 = vector.shape_cast %3 : vector<1x24x1xf32> to vector<24x1xf32>
    %5 = vector.broadcast %4 : vector<24x1xf32> to vector<24x128xf32>
    %6 = arith.addf %2, %5 : vector<24x128xf32>
    %cst_6 = arith.constant 0.000000e+00 : f32
    %7 = vector.broadcast %cst_6 : f32 to vector<24x128xf32>
    %8 = arith.maximumf %6, %7 : vector<24x128xf32>
    %c1 = arith.constant 1 : index
    %c0_7 = arith.constant 0 : index
    %c0_8 = arith.constant 0 : index
    %9 = vector.load %arg3[%c1, %c0_7, %c0_8] : memref<3x24x1xf32, #tpu.memory_space<vmem>>, vector<1x24x1xf32>
    %10 = vector.shape_cast %9 : vector<1x24x1xf32> to vector<24x1xf32>
    %11 = vector.broadcast %10 : vector<24x1xf32> to vector<24x128xf32>
    %12 = arith.mulf %8, %11 : vector<24x128xf32>
    %c2 = arith.constant 2 : index
    %c0_9 = arith.constant 0 : index
    %c0_10 = arith.constant 0 : index
    %13 = vector.load %arg3[%c2, %c0_9, %c0_10] : memref<3x24x1xf32, #tpu.memory_space<vmem>>, vector<1x24x1xf32>
    %14 = vector.shape_cast %13 : vector<1x24x1xf32> to vector<24x1xf32>
    %15 = vector.broadcast %14 : vector<24x1xf32> to vector<24x128xf32>
    %16 = arith.addf %12, %15 : vector<24x128xf32>
    %c0_11 = arith.constant 0 : index
    %c0_12 = arith.constant 0 : index
    %17 = vector.load %arg4[%c0_11, %c0_12] : memref<24x128xf32, #tpu.memory_space<vmem>>, vector<24x128xf32>
    tpu.vector_store %arg4[%c0_11, %c0_12], %16 {strides = array<i32>} : memref<24x128xf32, #tpu.memory_space<vmem>>, vector<24x128xf32>,
    return
  }
  func.func @transform_0(%arg0: i32) -> (i32, i32) {
    %c0_i32 = arith.constant 0 : i32
    %c0_i32_0 = arith.constant 0 : i32
    %c0_i32_1 = arith.constant 0 : i32
    return %c0_i32, %c0_i32_0 : i32, i32
  }
  func.func @transform_1(%arg0: i32) -> (i32, i32) {
    %c0_i32 = arith.constant 0 : i32
    %c0_i32_0 = arith.constant 0 : i32
    return %c0_i32, %arg0 : i32, i32
  }
  func.func @transform_2(%arg0: i32) -> (i32, i32, i32) {
    %c0_i32 = arith.constant 0 : i32
    %c0_i32_0 = arith.constant 0 : i32
    %c0_i32_1 = arith.constant 0 : i32
    %c0_i32_2 = arith.constant 0 : i32
    return %c0_i32, %c0_i32_0, %c0_i32_1 : i32, i32, i32
  }
  func.func @transform_3(%arg0: i32) -> (i32, i32) {
    %c0_i32 = arith.constant 0 : i32
    %c0_i32_0 = arith.constant 0 : i32
    return %c0_i32, %arg0 : i32, i32
  }
}

module attributes {stable_mosaic.version = 11 : i64} {
  func.func @_fused_conv_mm_kernel(%arg0: i32, %arg1: memref<40x64xbf16, #tpu.memory_space<vmem>>, %arg2: memref<64x128xbf16, #tpu.memory_space<vmem>>, %arg3: memref<3x40x1xf32, #tpu.memory_space<vmem>>, %arg4: memref<40x128xf32, #tpu.memory_space<vmem>>) attributes {dimension_semantics = [#tpu.dimension_semantics<parallel>], iteration_bounds = array<i64: 1>, scalar_prefetch = 0 : i64, scratch_operands = 0 : i64, tpu.core_type = #tpu.core_type<tc>, window_params = [{pipeline_mode = #tpu.pipeline_mode<synchronous>, transform_indices = @transform_0, window_bounds = array<i64: 40, 64>}, {transform_indices = @transform_1, window_bounds = array<i64: 64, 128>}, {pipeline_mode = #tpu.pipeline_mode<synchronous>, transform_indices = @transform_2, window_bounds = array<i64: 3, 40, 1>}, {transform_indices = @transform_3, window_bounds = array<i64: 40, 128>}]} {
    %c0 = arith.constant 0 : index
    %c0_0 = arith.constant 0 : index
    %0 = vector.load %arg1[%c0, %c0_0] : memref<40x64xbf16, #tpu.memory_space<vmem>>, vector<40x64xbf16>
    %c0_1 = arith.constant 0 : index
    %c0_2 = arith.constant 0 : index
    %1 = vector.load %arg2[%c0_1, %c0_2] : memref<64x128xbf16, #tpu.memory_space<vmem>>, vector<64x128xbf16>
    %cst = arith.constant dense<0.000000e+00> : vector<40x128xf32>
    %2 = tpu.matmul %0, %1, %cst {dimension_numbers = #tpu.dot_dimension_numbers<[1], [0], [0], [1], [0, 0, 1, 1], [], []>} : vector<40x64xbf16>, vector<64x128xbf16>, vector<40x128xf32> -> vector<40x128xf32>
    %c0_3 = arith.constant 0 : index
    %c0_4 = arith.constant 0 : index
    %c0_5 = arith.constant 0 : index
    %3 = vector.load %arg3[%c0_3, %c0_4, %c0_5] : memref<3x40x1xf32, #tpu.memory_space<vmem>>, vector<1x40x1xf32>
    %4 = vector.shape_cast %3 : vector<1x40x1xf32> to vector<40x1xf32>
    %5 = vector.broadcast %4 : vector<40x1xf32> to vector<40x128xf32>
    %6 = arith.addf %2, %5 : vector<40x128xf32>
    %cst_6 = arith.constant 0.000000e+00 : f32
    %7 = vector.broadcast %cst_6 : f32 to vector<40x128xf32>
    %8 = arith.maximumf %6, %7 : vector<40x128xf32>
    %c1 = arith.constant 1 : index
    %c0_7 = arith.constant 0 : index
    %c0_8 = arith.constant 0 : index
    %9 = vector.load %arg3[%c1, %c0_7, %c0_8] : memref<3x40x1xf32, #tpu.memory_space<vmem>>, vector<1x40x1xf32>
    %10 = vector.shape_cast %9 : vector<1x40x1xf32> to vector<40x1xf32>
    %11 = vector.broadcast %10 : vector<40x1xf32> to vector<40x128xf32>
    %12 = arith.mulf %8, %11 : vector<40x128xf32>
    %c2 = arith.constant 2 : index
    %c0_9 = arith.constant 0 : index
    %c0_10 = arith.constant 0 : index
    %13 = vector.load %arg3[%c2, %c0_9, %c0_10] : memref<3x40x1xf32, #tpu.memory_space<vmem>>, vector<1x40x1xf32>
    %14 = vector.shape_cast %13 : vector<1x40x1xf32> to vector<40x1xf32>
    %15 = vector.broadcast %14 : vector<40x1xf32> to vector<40x128xf32>
    %16 = arith.addf %12, %15 : vector<40x128xf32>
    %c0_11 = arith.constant 0 : index
    %c0_12 = arith.constant 0 : index
    %17 = vector.load %arg4[%c0_11, %c0_12] : memref<40x128xf32, #tpu.memory_space<vmem>>, vector<40x128xf32>
    tpu.vector_store %arg4[%c0_11, %c0_12], %16 {strides = array<i32>} : memref<40x128xf32, #tpu.memory_space<vmem>>, vector<40x128xf32>,
    return
  }
  func.func @transform_0(%arg0: i32) -> (i32, i32) {
    %c0_i32 = arith.constant 0 : i32
    %c0_i32_0 = arith.constant 0 : i32
    %c0_i32_1 = arith.constant 0 : i32
    return %c0_i32, %c0_i32_0 : i32, i32
  }
  func.func @transform_1(%arg0: i32) -> (i32, i32) {
    %c0_i32 = arith.constant 0 : i32
    %c0_i32_0 = arith.constant 0 : i32
    return %c0_i32, %arg0 : i32, i32
  }
  func.func @transform_2(%arg0: i32) -> (i32, i32, i32) {
    %c0_i32 = arith.constant 0 : i32
    %c0_i32_0 = arith.constant 0 : i32
    %c0_i32_1 = arith.constant 0 : i32
    %c0_i32_2 = arith.constant 0 : i32
    return %c0_i32, %c0_i32_0, %c0_i32_1 : i32, i32, i32
  }
  func.func @transform_3(%arg0: i32) -> (i32, i32) {
    %c0_i32 = arith.constant 0 : i32
    %c0_i32_0 = arith.constant 0 : i32
    return %c0_i32, %arg0 : i32, i32
  }
}

module attributes {stable_mosaic.version = 11 : i64} {
  func.func @_fused_conv_mm_kernel(%arg0: i32, %arg1: memref<24x16xbf16, #tpu.memory_space<vmem>>, %arg2: memref<16x256xbf16, #tpu.memory_space<vmem>>, %arg3: memref<3x24x1xf32, #tpu.memory_space<vmem>>, %arg4: memref<24x256xf32, #tpu.memory_space<vmem>>) attributes {dimension_semantics = [#tpu.dimension_semantics<parallel>], iteration_bounds = array<i64: 2>, scalar_prefetch = 0 : i64, scratch_operands = 0 : i64, tpu.core_type = #tpu.core_type<tc>, window_params = [{pipeline_mode = #tpu.pipeline_mode<synchronous>, transform_indices = @transform_0, window_bounds = array<i64: 24, 16>}, {transform_indices = @transform_1, window_bounds = array<i64: 16, 256>}, {pipeline_mode = #tpu.pipeline_mode<synchronous>, transform_indices = @transform_2, window_bounds = array<i64: 3, 24, 1>}, {transform_indices = @transform_3, window_bounds = array<i64: 24, 256>}]} {
    %c0 = arith.constant 0 : index
    %c0_0 = arith.constant 0 : index
    %0 = vector.load %arg1[%c0, %c0_0] : memref<24x16xbf16, #tpu.memory_space<vmem>>, vector<24x16xbf16>
    %c0_1 = arith.constant 0 : index
    %c0_2 = arith.constant 0 : index
    %1 = vector.load %arg2[%c0_1, %c0_2] : memref<16x256xbf16, #tpu.memory_space<vmem>>, vector<16x256xbf16>
    %cst = arith.constant dense<0.000000e+00> : vector<24x256xf32>
    %2 = tpu.matmul %0, %1, %cst {dimension_numbers = #tpu.dot_dimension_numbers<[1], [0], [0], [1], [0, 0, 1, 1], [], []>} : vector<24x16xbf16>, vector<16x256xbf16>, vector<24x256xf32> -> vector<24x256xf32>
    %c0_3 = arith.constant 0 : index
    %c0_4 = arith.constant 0 : index
    %c0_5 = arith.constant 0 : index
    %3 = vector.load %arg3[%c0_3, %c0_4, %c0_5] : memref<3x24x1xf32, #tpu.memory_space<vmem>>, vector<1x24x1xf32>
    %4 = vector.shape_cast %3 : vector<1x24x1xf32> to vector<24x1xf32>
    %5 = vector.broadcast %4 : vector<24x1xf32> to vector<24x256xf32>
    %6 = arith.addf %2, %5 : vector<24x256xf32>
    %c0_6 = arith.constant 0 : index
    %c0_7 = arith.constant 0 : index
    %7 = vector.load %arg4[%c0_6, %c0_7] : memref<24x256xf32, #tpu.memory_space<vmem>>, vector<24x256xf32>
    tpu.vector_store %arg4[%c0_6, %c0_7], %6 {strides = array<i32>} : memref<24x256xf32, #tpu.memory_space<vmem>>, vector<24x256xf32>,
    return
  }
  func.func @transform_0(%arg0: i32) -> (i32, i32) {
    %c0_i32 = arith.constant 0 : i32
    %c0_i32_0 = arith.constant 0 : i32
    %c0_i32_1 = arith.constant 0 : i32
    return %c0_i32, %c0_i32_0 : i32, i32
  }
  func.func @transform_1(%arg0: i32) -> (i32, i32) {
    %c0_i32 = arith.constant 0 : i32
    %c0_i32_0 = arith.constant 0 : i32
    return %c0_i32, %arg0 : i32, i32
  }
  func.func @transform_2(%arg0: i32) -> (i32, i32, i32) {
    %c0_i32 = arith.constant 0 : i32
    %c0_i32_0 = arith.constant 0 : i32
    %c0_i32_1 = arith.constant 0 : i32
    %c0_i32_2 = arith.constant 0 : i32
    return %c0_i32, %c0_i32_0, %c0_i32_1 : i32, i32, i32
  }
  func.func @transform_3(%arg0: i32) -> (i32, i32) {
    %c0_i32 = arith.constant 0 : i32
    %c0_i32_0 = arith.constant 0 : i32
    return %c0_i32, %arg0 : i32, i32
  }
}

</mosaic_0001>

<bundles_post_ra>
// kernel: tile.33
= control target key start
LH: loop header
LB: loop body
LE: loop exit
PB: predicated region body
PF: predicated region fallthrough
CT: control target
= control target key end

     0   :  { %2 = vsyncpa [#allocation1], 0  ;;  %s48_s8 = smov [#allocation0]   ;;  %s65_s0 = inlined_call_operand.hbm [shape: f32[12], index: 0, kind: input, shape index: {}]   ;;  %s66_s1 = inlined_call_operand.vmem [shape: f32[3,12], index: 1, kind: output, shape index: {}]  }
   0x1   :  { %s8_s0 = sshll.u32 %s65_s0, 4  ;;  %s10_s9 = sshll.u32 %s48_s8, 4  ;;  %s9_s0 = int_to_ptr.hbm [resolvable:$true] %s8_s0  ;;  %s11_s9 = int_to_ptr.vmem [resolvable:$true] %s10_s9 }
   0x2   :  { %13 = dma.hbm_to_vmem [thread:$0]  %s9_s0, 16, %s11_s9, [#allocation1]  }
   0x3   :  { %46 = dma.done.wait [#allocation1], 16  }
   0x4   :  { %47 = vsyncadd [#allocation1], 4294967280  ;;  %v18_v0 = vld [vmem:[#allocation0] ss:$0 sm:$0xff] }
   0x5   :  { %19 = vst [vmem:[%s66_s1] sm:$0xf] %v18_v0 }
   0x6   :  { %20 = vsyncpa [#allocation1], 1 }

// kernel: tile.34
= control target key start
LH: loop header
LB: loop body
LE: loop exit
PB: predicated region body
PF: predicated region fallthrough
CT: control target
= control target key end

     0   :  { %s30_s8 = smov 12   ;;  %vm7_vm0 = vcmask 97280   ;;  %vm13_vm1 = vcmask 294080   ;;  %vm19_vm2 = vcmask 195680   ;;  %s47_s0 = inlined_call_operand.vmem [shape: f32[3,12], index: 0, kind: input, shape index: {}]   ;;  %s48_s1 = inlined_call_operand.vmem [shape: f32[36], index: 1, kind: output, shape index: {}]  }
   0x1   :  { %v4_v0 = vld [vmem:[%s47_s0] sm:$0xf]  ;;  %s29_s0 = smov 24  }
   0x2   :  { %5 = vst [vmem:[#allocation1] sm:$0xf] %v4_v0 }
   0x9   :  { %v10_v1 = vld [vmem:[#allocation1 + $0x2] sm:$0x1]   ;;  %v16_v2 = vld [vmem:[#allocation1 + $0x1] sm:$0x1]   ;;  %v6_v3 = vld [vmem:[#allocation1] sm:$0x1]  }
   0xa   :  { %11 = vrot.lane.b32.xlu0 %v10_v1, %s29_s0  ;;  %8 = vst.msk [vmem:[#allocation0] sm:$0x1] %vm7_vm0, %v6_v3  }
  0x12   :  { %17 = vrot.lane.b32.xlu0 %v16_v2, %s30_s8 }
  0x7c   :  { %v12_v4 = vpop.permute.xlu0 %11  }
  0x7d   :  { %14 = vst.msk [vmem:[#allocation0] sm:$0x1] %vm13_vm1, %v12_v4  }
  0x84   :  { %v18_v5 = vpop.permute.xlu0 %17  }
  0x85   :  { %20 = vst.msk [vmem:[#allocation0] sm:$0x1] %vm19_vm2, %v18_v5  }
  0x8c   :  { %v23_v6 = vld [vmem:[#allocation0] sm:$0x1] }
  0x8d   :  { %26 = vst [vmem:[%s48_s1] sm:$0x1] %v23_v6 }

// kernel: tile.53
= control target key start
LH: loop header
LB: loop body
LE: loop exit
PB: predicated region body
PF: predicated region fallthrough
CT: control target
= control target key end

     0   :  { %2 = vsyncpa [#allocation1], 0  ;;  %s51_s8 = smov [#allocation0]   ;;  %s71_s0 = inlined_call_operand.hbm [shape: f32[2], index: 0, kind: input, shape index: {}]   ;;  %s72_s1 = inlined_call_operand.vmem [shape: f32[9,2], index: 1, kind: output, shape index: {}]  }
   0x1   :  { %s8_s0 = sshll.u32 %s71_s0, 4  ;;  %s10_s9 = sshll.u32 %s51_s8, 4  ;;  %s9_s0 = int_to_ptr.hbm [resolvable:$true] %s8_s0  ;;  %s11_s9 = int_to_ptr.vmem [resolvable:$true] %s10_s9 }
   0x2   :  { %13 = dma.hbm_to_vmem [thread:$0]  %s9_s0, 16, %s11_s9, [#allocation1]  }
   0x3   :  { %49 = dma.done.wait [#allocation1], 16  }
   0x4   :  { %50 = vsyncadd [#allocation1], 4294967280  ;;  %v18_v0 = vld [vmem:[#allocation0] ss:$0 sm:$0xff] }
   0x5   :  { %19 = vst [vmem:[%s72_s1] sm:$0xff] %v18_v0 }
   0x6   :  { %23 = vst [vmem:[%s72_s1 + $0x8] sm:$0xff] %v18_v0 }
   0x7   :  { %22 = vsyncpa [#allocation1], 1 }

// kernel: tile.54
= control target key start
LH: loop header
LB: loop body
LE: loop exit
PB: predicated region body
PF: predicated region fallthrough
CT: control target
= control target key end

     0   :  { %s75_s10 = smov 16   ;;  %s76_s11 = smov 12   ;;  %vm3_vm0 = vcmask 15360   ;;  %vm9_vm1 = vcmask 146560   ;;  %vm15_vm2 = vcmask 130160   ;;  %vm21_vm3 = vcmask 113760   ;;  %s123_s0 = inlined_call_operand.vmem [shape: f32[9,2], index: 0, kind: input, shape index: {}]   ;;  %s124_s1 = inlined_call_operand.vmem [shape: f32[18], index: 1, kind: output, shape index: {}]  }
   0x1   :  { %v59_v0 = vld [vmem:[%s123_s0 + $0x8] sm:$0x1]   ;;  %v61_v1 = vld [vmem:[%s123_s0 + $0x6] sm:$0x1]   ;;  %v63_v2 = vld [vmem:[%s123_s0 + $0x4] sm:$0x1]  }
   0x2   :  { %7 = vrot.lane.b32.xlu0 %v59_v0, %s75_s10  ;;  %19 = vrot.lane.b32.xlu1 %v61_v1, %s76_s11  ;;  %s77_s14 = smov 8   ;;  %v60_v3 = vld [vmem:[%s123_s0 + $0x7] sm:$0x1]   ;;  %v62_v4 = vld [vmem:[%s123_s0 + $0x5] sm:$0x1]   ;;  %s78_s19 = smov 14  }
   0x3   :  { %31 = vrot.lane.b32.xlu2 %v63_v2, %s77_s14  ;;  %s79_s20 = smov 10   ;;  %v64_v5 = vld [vmem:[%s123_s0 + $0x3] sm:$0x1]   ;;  %s80_s23 = smov 6   ;;  %v65_v6 = vld [vmem:[%s123_s0 + $0x2] sm:$0x1]  }
   0x4   :  { %v66_v7 = vld [vmem:[%s123_s0 + $0x1] sm:$0x1]   ;;  %s81_s28 = smov 4   ;;  %s82_s29 = smov 2   ;;  %v2_v8 = vld [vmem:[%s123_s0] sm:$0x1]  }
   0x5   :  { %4 = vst.msk [vmem:[#allocation0] sm:$0x1] %vm3_vm0, %v2_v8   ;;  %vm27_vm4 = vcmask 97360   ;;  %vm33_vm5 = vcmask 80960   ;;  %vm39_vm6 = vcmask 64560   ;;  %vm45_vm7 = vcmask 48160  }
   0x6   :  { %vm51_vm8 = vcmask 31760  }
   0xa   :  { %13 = vrot.lane.b32.xlu0 %v60_v3, %s78_s19  ;;  %25 = vrot.lane.b32.xlu1 %v62_v4, %s79_s20 }
   0xb   :  { %37 = vrot.lane.b32.xlu2 %v64_v5, %s80_s23 }
  0x12   :  { %43 = vrot.lane.b32.xlu0 %v65_v6, %s81_s28  ;;  %49 = vrot.lane.b32.xlu1 %v66_v7, %s82_s29 }
  0x5d   :  { %v32_v9 = vpop.permute.xlu2 %31  }
  0x65   :  { %v38_v10 = vpop.permute.xlu2 %37  }
  0x74   :  { %v8_v11 = vpop.permute.xlu0 %7   ;;  %v20_v12 = vpop.permute.xlu1 %19  }
  0x75   :  { %10 = vst.msk [vmem:[#allocation0] sm:$0x1] %vm9_vm1, %v8_v11  }
  0x7c   :  { %v14_v13 = vpop.permute.xlu0 %13   ;;  %v26_v14 = vpop.permute.xlu1 %25  }
  0x7d   :  { %16 = vst.msk [vmem:[#allocation0] sm:$0x1] %vm15_vm2, %v14_v13  }
  0x7e   :  { %22 = vst.msk [vmem:[#allocation0] sm:$0x1] %vm21_vm3, %v20_v12  }
  0x7f   :  { %28 = vst.msk [vmem:[#allocation0] sm:$0x1] %vm27_vm4, %v26_v14  }
  0x80   :  { %34 = vst.msk [vmem:[#allocation0] sm:$0x1] %vm33_vm5, %v32_v9  }
  0x81   :  { %40 = vst.msk [vmem:[#allocation0] sm:$0x1] %vm39_vm6, %v38_v10  }
  0x84   :  { %v44_v15 = vpop.permute.xlu0 %43   ;;  %v50_v16 = vpop.permute.xlu1 %49  }
  0x85   :  { %46 = vst.msk [vmem:[#allocation0] sm:$0x1] %vm45_vm7, %v44_v15  }
  0x86   :  { %52 = vst.msk [vmem:[#allocation0] sm:$0x1] %vm51_vm8, %v50_v16  }
  0x8d   :  { %v55_v17 = vld [vmem:[#allocation0] sm:$0x1] }
  0x8e   :  { %58 = vst [vmem:[%s124_s1] sm:$0x1] %v55_v17 }

// kernel: openunmix_forward.8
= control target key start
LH: loop header
LB: loop body
LE: loop exit
PB: predicated region body
PF: predicated region fallthrough
CT: control target
= control target key end

     0   :  { %s543_s12 = smov 0   ;;  %s545_s13 = smov 0   ;;  %s628_s0 = inlined_call_operand.vmem [shape: bf16[16,32], index: 0, kind: input, shape index: {}]   ;;  %s629_s1 = inlined_call_operand.vmem [shape: bf16[32,512], index: 1, kind: input, shape index: {}]   ;;  %s630_s2 = inlined_call_operand.vmem [shape: f32[3,16,1], index: 2, kind: input, shape index: {}]   ;;  %s631_s3 = inlined_call_operand.vmem [shape: f32[16,512], index: 3, kind: output, shape index: {}]  }
   0x1   :  { %s547_s14 = smov 0  }
   0x2 LB: > { %s422_s15 = sadd.s32 4294967295, %s520_s14   ;;  %s560_s16 = sadd.s32 1, %s520_s14   ;;  %s520_s14 = sphi %s547_s14, %s635_s14   ;;  %s516_s13 = sphi %s545_s13, %s634_s13   ;;  %s512_s12 = sphi %s543_s12, %s633_s12  }
   0x3   : > { %s38_s17 = ssub.s32 %s520_s14, %s560_s16  ;;  %s41_s18 = sadd.s32 1, %s516_s13 }
   0x4   : > { %p39_p0 = scmp.eq.s32.totalorder %s38_s17, 0  ;;  %p48_p1 = scmp.ne.s32.totalorder %s516_s13, %s512_s12 }
   0x5   : > { %p49_p2 = scmp.eq.s32.totalorder %s520_s14, 0  ;;  %p99_p3 = scmp.eq.s32.totalorder %s422_s15, 1 }
   0x6   : > { %s571_s19 = scalar_select %p39_p0, %s516_s13, %s41_s18  }
   0x7   : > { %p50_p4 = por %p49_p2, %p48_p1  ;;  %p573_p5 = por %p99_p3, %p48_p1 }
   0x8   : > { %p425_p6 = scmp.ge.s32.totalorder %s520_s14, 2 }
   0xa   : > { %127 = sbr.rel (%p425_p6) target bundleno = 23 (0x17), region = 24 }
   0xf   : > { %130 = sbr.rel (!%p50_p4) target bundleno = 23 (0x17), region = 28  ;;  %s132_s21 = sand.u32 (%p50_p4), 1, %s516_s13  }
  0x10   : > { %s463_s22 = sshll.u32 (%p50_p4), %s520_s14, 3  ;;  %s426_s23 = sshll.u32 (%p50_p4), %s132_s21, 5 }
  0x11   : > { %s137_s26 = scalar_lea.vmem (%p50_p4), %s629_s1, %s463_s22  ;;  %s134_s27 = scalar_lea.vmem (%p50_p4), [#allocation2], %s426_s23 }
  0x12   : > { %v172_v0 = vld [vmem:[%s137_s26] sm:$0xff] (%p50_p4)  ;;  %v174_v1 = vld [vmem:[%s137_s26 + $0x10] sm:$0xff] (%p50_p4) }
  0x13   : > { %v176_v2 = vld [vmem:[%s137_s26 + $0x20] sm:$0xff] (%p50_p4)  ;;  %173 = vst [vmem:[%s134_s27] sm:$0xff] (%p50_p4), %v172_v0  ;;  %v178_v3 = vld [vmem:[%s137_s26 + $0x30] sm:$0xff] (%p50_p4) }
  0x14   : > { %175 = vst [vmem:[%s134_s27 + $0x8] sm:$0xff] %v174_v1 }
  0x15   : > { %177 = vst [vmem:[%s134_s27 + $0x10] sm:$0xff] %v176_v2 }
  0x16   : > { %179 = vst [vmem:[%s134_s27 + $0x18] sm:$0xff] %v178_v3 }
  0x17 PF: > { %p429_p7 = scmp.ge.s32.totalorder %s520_s14, 1  ;;  %p184_p8 = scmp.lt.s32.totalorder %s520_s14, 3 }
  0x19   : > { %p185_p9 = pnand %p429_p7, %p184_p8 }
  0x1a   : > { %s191_s28 = sand.u32 (!%p185_p9), 1, %s512_s12  }
  0x1b   : > { %188 = sbr.rel (%p185_p9) target bundleno = 195 (0xc3), region = 66  ;;  %s592_s6 = sshll.u32 (!%p185_p9), %s191_s28, 5 }
  0x1c   : > { %s193_s9 = scalar_lea.vmem (!%p185_p9), [#allocation2], %s592_s6  ;;  %s212_s24 = scalar_lea.vmem (!%p185_p9), [#allocation3], %s592_s6 }
  0x20   : > { %v222_v4 = vld [vmem:[%s630_s2] sm:$0xff]  ;;  %v454_v5 = vld [vmem:[%s630_s2 + $0x10] sm:$0xff]  ;;  %v522_v6 = vmov 0   ;;  %v468_v9 = vld [vmem:[%s193_s9 + $0x14] sm:$0xf0]  ;;  %vm259_vm0 = vcmask 261120  }
  0x21   : > { %495 = vset.pattern.permute.xlu0 %v522_v6  ;;  %496 = vset.pattern.permute.xlu1 %v522_v6  ;;  %v456_v7 = vld [vmem:[%s630_s2 + $0x20] sm:$0xff]  ;;  %v446_v8 = vld [vmem:[%s193_s9 + $0x10] sm:$0xf]  ;;  %v467_v10 = vld [vmem:[%s193_s9 + $0x14] sm:$0xf]  ;;  %s469_s25 = sshll.u32 (%p573_p5), %s422_s15, 4 }
  0x22   : > { %226 = vperm.xlu0 %495, %v222_v4   ;;  %300 = vperm.xlu1 %496, %v454_v5   ;;  %v447_v11 = vor.u32 %v468_v9, %v446_v8  ;;  %v448_v12 = vld [vmem:[%s193_s9 + $0x18] sm:$0xf0]  ;;  %v438_v13 = vld [vmem:[%s193_s9] sm:$0xf]  ;;  %v466_v14 = vld [vmem:[%s193_s9 + $0x4] sm:$0xf0]  ;;  %s342_s28 = scalar_lea.vmem (%p573_p5), %s631_s3, %s469_s25 }
  0x23   : > { %497 = vset.pattern.permute.xlu2 %v522_v6  ;;  %v451_v15 = vor.u32 %v467_v10, %v448_v12  ;;  %v465_v16 = vld [vmem:[%s193_s9 + $0x4] sm:$0xf]  ;;  %v440_v17 = vld [vmem:[%s193_s9 + $0x8] sm:$0xf0]  ;;  %v439_v18 = vor.u32 %v466_v14, %v438_v13  ;;  %v455_v21 = vld [vmem:[%s630_s2 + $0x18] sm:$0xff] }
  0x24   : > { %317 = vperm.xlu2 %497, %v456_v7   ;;  %269 = vmatpush.bf16.msra.mxu0 %v447_v11  ;;  %v443_v19 = vor.u32 %v465_v16, %v440_v17  ;;  %v223_v20 = vld [vmem:[%s630_s2 + $0x8] sm:$0xff]  ;;  %v464_v22 = vld [vmem:[%s628_s0] sm:$0xff] }
  0x25   : > { %283 = vmatpush.bf16.msra.mxu1 %v451_v15  ;;  %v457_v23 = vld [vmem:[%s630_s2 + $0x28] sm:$0xff] }
  0x28   : > { %270 = vmatpush.bf16.msra.mxu0 %v439_v18 }
  0x29   : > { %284 = vmatpush.bf16.msra.mxu1 %v443_v19 }
  0x2a   : > { %231 = vperm.xlu0 %495, %v223_v20   ;;  %305 = vperm.xlu1 %496, %v455_v21  }
  0x2b   : > { %452 = vmatmul.msk.bf16.vlgmr.msra.gmra.mxu0 %vm259_vm0, %v464_v22 }
  0x2c   : > { %322 = vperm.xlu2 %497, %v457_v23   ;;  %453 = vmatmul.msk.bf16.vlgmr.msra.gmra.mxu1 %vm259_vm0, %v464_v22 }
  0x7e   : > { %v318_v31 = vpop.permute.xlu2 %317 }
  0x86   : > { %v323_v46 = vpop.permute.xlu2 %322 }
  0x94   : > { %v227_v24 = vpop.permute.xlu0 %226  ;;  %v301_v28 = vpop.permute.xlu1 %300 }
  0x9c   : > { %v232_v36 = vpop.permute.xlu0 %231  ;;  %v306_v43 = vpop.permute.xlu1 %305 }
  0xa8   : > { %v272_v25 = vpop.f32.mrf.mxu0 }
  0xa9   : > { %v273_v26 = vadd.f32 %v272_v25, %v227_v24  ;;  %v286_v27 = vpop.f32.mrf.mxu1 }
  0xaa   : > { %v287_v29 = vadd.f32 %v286_v27, %v227_v24 }
  0xab   : > { %v291_v30 = vmax.f32 %v273_v26, 0.0 }
  0xac   : > { %v292_v32 = vmax.f32 %v287_v29, 0.0 }
  0xad   : > { %v308_v33 = vmul.f32 %v301_v28, %v291_v30 }
  0xae   : > { %v309_v34 = vmul.f32 %v301_v28, %v292_v32 }
  0xaf   : > { %v325_v35 = vadd.f32 %v318_v31, %v308_v33 }
  0xb0   : > { %v326_v37 = vadd.f32 %v318_v31, %v309_v34  ;;  %v274_v38 = vpop.f32.mrf.mxu0 }
  0xb1   : > { %329 = vst [vmem:[%s212_s24] sm:$0xff] %v325_v35  ;;  %v275_v39 = vadd.f32 %v274_v38, %v232_v36  ;;  %v288_v40 = vpop.f32.mrf.mxu1 }
  0xb2   : > { %330 = vst [vmem:[%s212_s24 + $0x8] sm:$0xff] %v326_v37  ;;  %v289_v41 = vadd.f32 %v288_v40, %v232_v36 }
  0xb3   : > { %v293_v42 = vmax.f32 %v275_v39, 0.0 }
  0xb4   : > { %v294_v44 = vmax.f32 %v289_v41, 0.0 }
  0xb5   : > { %v310_v45 = vmul.f32 %v306_v43, %v293_v42 }
  0xb6   : > { %v311_v47 = vmul.f32 %v306_v43, %v294_v44  ;;  %339 = sbr.rel (!%p573_p5) target bundleno = 195 (0xc3), region = 74 }
  0xb7   : > { %v327_v48 = vadd.f32 %v323_v46, %v310_v45 }
  0xb8   : > { %v328_v49 = vadd.f32 %v323_v46, %v311_v47  ;;  %v355_v50 = vld [vmem:[%s212_s24] sm:$0xff] (%p573_p5) }
  0xb9   : > { %331 = vst [vmem:[%s212_s24 + $0x10] sm:$0xff] %v327_v48  ;;  %v357_v51 = vld [vmem:[%s212_s24 + $0x8] sm:$0xff] (%p573_p5) }
  0xba   : > { %332 = vst [vmem:[%s212_s24 + $0x18] sm:$0xff] %v328_v49 }
  0xbb   : > { %356 = vst [vmem:[%s342_s28] sm:$0xff] %v355_v50 }
  0xbc   : > { %358 = vst [vmem:[%s342_s28 + $0x8] sm:$0xff] %v357_v51 }
  0xc0   : > { %v359_v52 = vld [vmem:[%s212_s24 + $0x10] sm:$0xff] }
  0xc1   : > { %v361_v53 = vld [vmem:[%s212_s24 + $0x18] sm:$0xff]  ;;  %360 = vst [vmem:[%s342_s28 + $0x20] sm:$0xff] %v359_v52 }
  0xc2   : > { %362 = vst [vmem:[%s342_s28 + $0x28] sm:$0xff] %v361_v53 }
  0xc3 PF: > { %p10_p10 = scmp.ge.s32.totalorder %s560_s16, 4   ;;  %s633_s12 = smov %s516_s13 }
  0xc4   : > { %s634_s13 = smov %s571_s19  ;;  %s635_s14 = smov %s560_s16 }
  0xc5   :  { %12 = sbr.rel (!%p10_p10) target bundleno = 2 (0x2), region = 130 }

// kernel: openunmix_forward.9
= control target key start
LH: loop header
LB: loop body
LE: loop exit
PB: predicated region body
PF: predicated region fallthrough
CT: control target
= control target key end

     0   :  { %v238_v1 = vmov 0   ;;  %vm100_vm0 = vcmask 916480   ;;  %s322_s1 = inlined_call_operand.vmem [shape: bf16[112,128], index: 1, kind: input, shape index: {}]   ;;  %s323_s2 = inlined_call_operand.vmem [shape: f32[3,24,1], index: 2, kind: input, shape index: {}]   ;;  %s324_s0 = inlined_call_operand.vmem [shape: bf16[24,112], index: 0, kind: input, shape index: {}]   ;;  %s325_s3 = inlined_call_operand.vmem [shape: f32[24,128], index: 3, kind: output, shape index: {}]  }
   0x1   :  { %v226_v0 = vld [vmem:[%s322_s1 + $0x30] sm:$0xff]  ;;  %236 = vset.pattern.permute.xlu1 %v238_v1  ;;  %235 = vset.pattern.permute.xlu0 %v238_v1  ;;  %v225_v3 = vld [vmem:[%s322_s1 + $0x28] sm:$0xff]  ;;  %v32_v4 = vld [vmem:[%s323_s2] sm:$0xff] }
   0x2   :  { %v34_v2 = vld [vmem:[%s323_s2 + $0x10] sm:$0xff]  ;;  %237 = vset.pattern.permute.xlu2 %v238_v1  ;;  %108 = vmatpush.bf16.msra.mxu0 %v226_v0  ;;  %v214_v5 = vld [vmem:[%s323_s2 + $0x20] sm:$0xff]  ;;  %v213_v7 = vld [vmem:[%s323_s2 + $0x18] sm:$0xff] }
   0x3   :  { %227 = vmatpush.bf16.msra.mxu1 %v226_v0  ;;  %47 = vperm.xlu1 %236, %v34_v2   ;;  %v224_v6 = vld [vmem:[%s322_s1 + $0x20] sm:$0xff]  ;;  %v33_v8 = vld [vmem:[%s323_s2 + $0x8] sm:$0xff]  ;;  %v223_v9 = vld [vmem:[%s322_s1 + $0x18] sm:$0xff] }
   0x4   :  { %37 = vperm.xlu0 %235, %v32_v4   ;;  %139 = vperm.xlu2 %237, %v214_v5   ;;  %v215_v10 = vld [vmem:[%s323_s2 + $0x28] sm:$0xff]  ;;  %v222_v11 = vld [vmem:[%s322_s1 + $0x10] sm:$0xff]  ;;  %v217_v12 = vld [vmem:[%s323_s2 + $0x38] sm:$0xff] }
   0x5   :  { %v216_v13 = vld [vmem:[%s323_s2 + $0x30] sm:$0xff]  ;;  %v221_v14 = vld [vmem:[%s322_s1 + $0x8] sm:$0xff]  ;;  %v218_v16 = vld [vmem:[%s323_s2 + $0x40] sm:$0xff] }
   0x6   :  { %109 = vmatpush.bf16.msra.mxu0 %v225_v3  ;;  %v17_v15 = vld [vmem:[%s324_s0 + $0x8] sm:$0xf]  ;;  %v220_v18 = vld [vmem:[%s322_s1] sm:$0xff] }
   0x7   :  { %228 = vmatpush.bf16.msra.mxu1 %v225_v3  ;;  %v55_v17 = vunpack.c.l.b16 %v17_v15  ;;  %v219_v19 = vld [vmem:[%s324_s0] sm:$0xff] }
   0x9   :  { %v57_v20 = vpack.c.b16 %v55_v17, %v55_v17 }
   0xa   :  { %110 = vmatpush.bf16.msra.mxu0 %v224_v6 }
   0xb   :  { %229 = vmatpush.bf16.msra.mxu1 %v224_v6  ;;  %134 = vperm.xlu1 %236, %v213_v7  }
   0xc   :  { %42 = vperm.xlu0 %235, %v33_v8   ;;  %144 = vperm.xlu2 %237, %v215_v10  }
   0xe   :  { %111 = vmatpush.bf16.msra.mxu0 %v223_v9 }
   0xf   :  { %230 = vmatpush.bf16.msra.mxu1 %v223_v9 }
  0x12   :  { %112 = vmatpush.bf16.msra.mxu0 %v222_v11 }
  0x13   :  { %231 = vmatpush.bf16.msra.mxu1 %v222_v11  ;;  %161 = vperm.xlu1 %236, %v217_v12  }
  0x14   :  { %156 = vperm.xlu0 %235, %v216_v13   ;;  %166 = vperm.xlu2 %237, %v218_v16  }
  0x16   :  { %113 = vmatpush.bf16.msra.mxu0 %v221_v14 }
  0x17   :  { %232 = vmatpush.bf16.msra.mxu1 %v221_v14 }
  0x1a   :  { %114 = vmatpush.bf16.msra.mxu0 %v220_v18 }
  0x1b   :  { %233 = vmatpush.bf16.msra.mxu1 %v220_v18 }
  0x1d   :  { %211 = vmatmul.msk.bf16.vlgmr.msra.gmra.mxu0 %vm100_vm0, %v219_v19 }
  0x1e   :  { %212 = vmatmul.msk.bf16.vlgmr.msra.gmra.mxu1 %vm100_vm0, %v57_v20 }
  0x5e   :  { %v140_v21 = vpop.permute.xlu2 %139 }
  0x66   :  { %v145_v24 = vpop.permute.xlu2 %144 }
  0x6e   :  { %v167_v35 = vpop.permute.xlu2 %166 }
  0x75   :  { %v48_v23 = vpop.permute.xlu1 %47 }
  0x76   :  { %v38_v22 = vpop.permute.xlu0 %37 }
  0x7d   :  { %v135_v32 = vpop.permute.xlu1 %134 }
  0x7e   :  { %v43_v25 = vpop.permute.xlu0 %42 }
  0x85   :  { %v162_v44 = vpop.permute.xlu1 %161 }
  0x86   :  { %v157_v36 = vpop.permute.xlu0 %156 }
  0x9a   :  { %v116_v26 = vpop.f32.mrf.mxu0 }
  0x9b   :  { %v121_v27 = vpop.f32.mrf.mxu1  ;;  %v117_v28 = vadd.f32 %v116_v26, %v38_v22 }
  0x9c   :  { %v122_v29 = vadd.f32 %v121_v27, %v48_v23 }
  0x9d   :  { %v125_v30 = vmax.f32 %v117_v28, 0.0 }
  0x9e   :  { %v127_v31 = vmax.f32 %v122_v29, 0.0 }
  0x9f   :  { %v147_v33 = vmul.f32 %v135_v32, %v125_v30 }
  0xa0   :  { %v149_v34 = vmul.f32 %v145_v24, %v127_v31 }
  0xa1   :  { %v169_v37 = vadd.f32 %v157_v36, %v147_v33 }
  0xa2   :  { %v171_v38 = vadd.f32 %v167_v35, %v149_v34  ;;  %v118_v39 = vpop.f32.mrf.mxu0 }
  0xa3   :  { %v123_v40 = vpop.f32.mrf.mxu1  ;;  %172 = vst [vmem:[%s325_s3] sm:$0xff] %v169_v37  ;;  %v119_v41 = vadd.f32 %v118_v39, %v43_v25 }
  0xa4   :  { %174 = vst [vmem:[%s325_s3 + $0x10] sm:$0xff] %v171_v38 }
  0xa5   :  { %v126_v42 = vmax.f32 %v119_v41, 0.0 }
  0xa7   :  { %v148_v43 = vmul.f32 %v140_v21, %v126_v42 }
  0xa9   :  { %v170_v45 = vadd.f32 %v162_v44, %v148_v43 }
  0xab   :  { %173 = vst [vmem:[%s325_s3 + $0x8] sm:$0xff] %v170_v45 }

// kernel: openunmix_forward.10
= control target key start
LH: loop header
LB: loop body
LE: loop exit
PB: predicated region body
PF: predicated region fallthrough
CT: control target
= control target key end

     0   :  { %v374_v2 = vmov 0   ;;  %vm157_vm0 = vcmask 523264   ;;  %s505_s1 = inlined_call_operand.vmem [shape: bf16[192,128], index: 1, kind: input, shape index: {}]   ;;  %s506_s2 = inlined_call_operand.vmem [shape: f32[3,32,1], index: 2, kind: input, shape index: {}]   ;;  %s507_s0 = inlined_call_operand.vmem [shape: bf16[32,192], index: 0, kind: input, shape index: {}]   ;;  %s508_s3 = inlined_call_operand.vmem [shape: f32[32,128], index: 3, kind: output, shape index: {}]  }
   0x1   :  { %v357_v0 = vld [vmem:[%s505_s1 + $0x38] sm:$0xff]  ;;  %372 = vset.pattern.permute.xlu1 %v374_v2  ;;  %371 = vset.pattern.permute.xlu0 %v374_v2  ;;  %v356_v3 = vld [vmem:[%s505_s1 + $0x30] sm:$0xff]  ;;  %v43_v6 = vld [vmem:[%s506_s2] sm:$0xff] }
   0x2   :  { %v361_v1 = vld [vmem:[%s505_s1 + $0x58] sm:$0xff]  ;;  %373 = vset.pattern.permute.xlu2 %v374_v2  ;;  %164 = vmatpush.bf16.msra.mxu0 %v357_v0  ;;  %v360_v4 = vld [vmem:[%s505_s1 + $0x50] sm:$0xff]  ;;  %v355_v7 = vld [vmem:[%s505_s1 + $0x28] sm:$0xff] }
   0x3   :  { %362 = vmatpush.bf16.msra.mxu2 %v357_v0  ;;  %187 = vmatpush.bf16.msra.mxu1 %v361_v1  ;;  %v45_v5 = vld [vmem:[%s506_s2 + $0x10] sm:$0xff]  ;;  %v359_v8 = vld [vmem:[%s505_s1 + $0x48] sm:$0xff]  ;;  %v338_v9 = vld [vmem:[%s506_s2 + $0x20] sm:$0xff] }
   0x4   :  { %59 = vperm.xlu1 %372, %v45_v5   ;;  %49 = vperm.xlu0 %371, %v43_v6   ;;  %v46_v10 = vld [vmem:[%s506_s2 + $0x18] sm:$0xff]  ;;  %v44_v11 = vld [vmem:[%s506_s2 + $0x8] sm:$0xff]  ;;  %v354_v12 = vld [vmem:[%s505_s1 + $0x20] sm:$0xff] }
   0x5   :  { %213 = vperm.xlu2 %373, %v338_v9   ;;  %v358_v13 = vld [vmem:[%s505_s1 + $0x40] sm:$0xff]  ;;  %v276_v15 = vld [vmem:[%s507_s0 + $0x8] sm:$0xf0]  ;;  %v353_v17 = vld [vmem:[%s505_s1 + $0x18] sm:$0xff] }
   0x6   :  { %165 = vmatpush.bf16.msra.mxu0 %v356_v3  ;;  %v346_v14 = vld [vmem:[%s507_s0 + $0x4] sm:$0xf]  ;;  %v339_v18 = vld [vmem:[%s506_s2 + $0x28] sm:$0xff]  ;;  %v341_v19 = vld [vmem:[%s506_s2 + $0x38] sm:$0xff] }
   0x7   :  { %363 = vmatpush.bf16.msra.mxu2 %v356_v3  ;;  %188 = vmatpush.bf16.msra.mxu1 %v360_v4  ;;  %v279_v16 = vor.u32 %v346_v14, %v276_v15  ;;  %v340_v20 = vld [vmem:[%s506_s2 + $0x30] sm:$0xff]  ;;  %v351_v22 = vld [vmem:[%s505_s1 + $0x8] sm:$0xff]  ;;  %v342_v23 = vld [vmem:[%s506_s2 + $0x40] sm:$0xff] }
   0x8   :  { %v352_v21 = vld [vmem:[%s505_s1 + $0x10] sm:$0xff]  ;;  %v350_v24 = vld [vmem:[%s505_s1] sm:$0xff]  ;;  %v343_v26 = vld [vmem:[%s506_s2 + $0x48] sm:$0xff] }
   0x9   :  { %v344_v25 = vld [vmem:[%s506_s2 + $0x50] sm:$0xff]  ;;  %v274_v27 = vld [vmem:[%s507_s0] sm:$0xf]  ;;  %v347_v28 = vld [vmem:[%s507_s0 + $0x4] sm:$0xf0] }
   0xa   :  { %166 = vmatpush.bf16.msra.mxu0 %v355_v7  ;;  %v282_v29 = vld [vmem:[%s507_s0 + $0x10] sm:$0xf]  ;;  %v349_v30 = vld [vmem:[%s507_s0 + $0x14] sm:$0xf0]  ;;  %v348_v31 = vld [vmem:[%s507_s0 + $0x14] sm:$0xf]  ;;  %v275_v33 = vor.u32 %v347_v28, %v274_v27 }
   0xb   :  { %364 = vmatpush.bf16.msra.mxu2 %v355_v7  ;;  %189 = vmatpush.bf16.msra.mxu1 %v359_v8  ;;  %v284_v32 = vld [vmem:[%s507_s0 + $0x18] sm:$0xf0]  ;;  %v283_v34 = vor.u32 %v349_v30, %v282_v29 }
   0xc   :  { %64 = vperm.xlu1 %372, %v46_v10   ;;  %54 = vperm.xlu0 %371, %v44_v11   ;;  %v287_v35 = vor.u32 %v348_v31, %v284_v32  ;;  %v345_v36 = vld [vmem:[%s506_s2 + $0x58] sm:$0xff] }
   0xd   :  { %218 = vperm.xlu2 %373, %v339_v18  }
   0xe   :  { %167 = vmatpush.bf16.msra.mxu0 %v354_v12 }
   0xf   :  { %365 = vmatpush.bf16.msra.mxu2 %v354_v12  ;;  %190 = vmatpush.bf16.msra.mxu1 %v358_v13 }
  0x12   :  { %336 = vmatmul.msk.bf16.vlgmr.msra.gmra.mxu1 %vm157_vm0, %v279_v16  ;;  %168 = vmatpush.bf16.msra.mxu0 %v353_v17 }
  0x13   :  { %366 = vmatpush.bf16.msra.mxu2 %v353_v17 }
  0x14   :  { %228 = vperm.xlu1 %372, %v341_v19   ;;  %223 = vperm.xlu0 %371, %v340_v20  }
  0x15   :  { %242 = vperm.xlu2 %373, %v342_v23  }
  0x16   :  { %169 = vmatpush.bf16.msra.mxu0 %v352_v21 }
  0x17   :  { %367 = vmatpush.bf16.msra.mxu2 %v352_v21 }
  0x1a   :  { %170 = vmatpush.bf16.msra.mxu0 %v351_v22 }
  0x1b   :  { %368 = vmatpush.bf16.msra.mxu2 %v351_v22 }
  0x1c   :  { %252 = vperm.xlu1 %372, %v344_v25   ;;  %247 = vperm.xlu0 %371, %v343_v26  }
  0x1d   :  { %257 = vperm.xlu2 %373, %v345_v36  }
  0x1e   :  { %171 = vmatpush.bf16.msra.mxu0 %v350_v24 }
  0x1f   :  { %369 = vmatpush.bf16.msra.mxu2 %v350_v24 }
  0x21   :  { %172 = vmatmul.bf16.vlgmr.msra.gmra.mxu0 %v275_v33 }
  0x22   :  { %177 = vmatmul.bf16.vlgmr.msra.gmra.mxu2 %v283_v34  ;;  %337 = vmatmul.msk.bf16.gmra.mxu1 %vm157_vm0, %v287_v35 }
  0x5f   :  { %v214_v40 = vpop.permute.xlu2 %213 }
  0x67   :  { %v219_v44 = vpop.permute.xlu2 %218 }
  0x6f   :  { %v243_v54 = vpop.permute.xlu2 %242 }
  0x76   :  { %v60_v37 = vpop.permute.xlu1 %59  ;;  %v50_v38 = vpop.permute.xlu0 %49 }
  0x77   :  { %v258_v11 = vpop.permute.xlu2 %257 }
  0x7e   :  { %v65_v41 = vpop.permute.xlu1 %64  ;;  %v55_v42 = vpop.permute.xlu0 %54 }
  0x86   :  { %v229_v48 = vpop.permute.xlu1 %228  ;;  %v224_v50 = vpop.permute.xlu0 %223 }
  0x8e   :  { %v253_v0 = vpop.permute.xlu1 %252  ;;  %v248_v3 = vpop.permute.xlu0 %247 }
  0x8f   :  { %v192_v39 = vpop.f32.mrf.mxu1 }
  0x97   :  { %v194_v43 = vpop.f32.mrf.mxu1 }
  0x9e   :  { %v173_v45 = vpop.f32.mrf.mxu0 }
  0x9f   :  { %v174_v46 = vadd.f32 %v173_v45, %v50_v38  ;;  %v197_v52 = vpop.f32.mrf.mxu1 }
  0xa1   :  { %v193_v47 = vadd.f32 %v192_v39, %v174_v46 }
  0xa3   :  { %v202_v49 = vmax.f32 %v193_v47, 0.0 }
  0xa5   :  { %v231_v51 = vmul.f32 %v214_v40, %v202_v49  ;;  %v178_v53 = vpop.f32.mrf.mxu2 }
  0xa6   :  { %v179_v55 = vadd.f32 %v178_v53, %v60_v37  ;;  %v175_v56 = vpop.f32.mrf.mxu0 }
  0xa7   :  { %v260_v57 = vadd.f32 %v243_v54, %v231_v51  ;;  %v176_v58 = vadd.f32 %v175_v56, %v55_v42  ;;  %v199_v7 = vpop.f32.mrf.mxu1 }
  0xa8   :  { %v198_v59 = vadd.f32 %v197_v52, %v179_v55 }
  0xa9   :  { %264 = vst [vmem:[%s508_s3] sm:$0xff] %v260_v57  ;;  %v195_v60 = vadd.f32 %v194_v43, %v176_v58 }
  0xaa   :  { %v204_v61 = vmax.f32 %v198_v59, 0.0 }
  0xab   :  { %v203_v62 = vmax.f32 %v195_v60, 0.0 }
  0xac   :  { %v233_v63 = vmul.f32 %v224_v50, %v204_v61 }
  0xad   :  { %v232_v1 = vmul.f32 %v219_v44, %v203_v62  ;;  %v180_v2 = vpop.f32.mrf.mxu2 }
  0xae   :  { %v262_v4 = vadd.f32 %v253_v0, %v233_v63  ;;  %v181_v5 = vadd.f32 %v180_v2, %v65_v41 }
  0xaf   :  { %v261_v6 = vadd.f32 %v248_v3, %v232_v1 }
  0xb0   :  { %266 = vst [vmem:[%s508_s3 + $0x10] sm:$0xff] %v262_v4  ;;  %v200_v8 = vadd.f32 %v199_v7, %v181_v5 }
  0xb1   :  { %265 = vst [vmem:[%s508_s3 + $0x8] sm:$0xff] %v261_v6 }
  0xb2   :  { %v205_v9 = vmax.f32 %v200_v8, 0.0 }
  0xb4   :  { %v234_v10 = vmul.f32 %v229_v48, %v205_v9 }
  0xb6   :  { %v263_v12 = vadd.f32 %v258_v11, %v234_v10 }
  0xb8   :  { %267 = vst [vmem:[%s508_s3 + $0x18] sm:$0xff] %v263_v12 }

// kernel: openunmix_forward.11
= control target key start
LH: loop header
LB: loop body
LE: loop exit
PB: predicated region body
PF: predicated region fallthrough
CT: control target
= control target key end

     0   :  { %v536_v2 = vmov 0   ;;  %vm231_vm0 = vcmask 130048   ;;  %s713_s1 = inlined_call_operand.vmem [shape: bf16[272,128], index: 1, kind: input, shape index: {}]   ;;  %s714_s2 = inlined_call_operand.vmem [shape: f32[3,40,1], index: 2, kind: input, shape index: {}]   ;;  %s715_s0 = inlined_call_operand.vmem [shape: bf16[40,272], index: 0, kind: input, shape index: {}]   ;;  %s716_s3 = inlined_call_operand.vmem [shape: f32[40,128], index: 3, kind: output, shape index: {}]  }
   0x1   :  { %v514_v0 = vld [vmem:[%s713_s1 + $0x38] sm:$0xff]  ;;  %534 = vset.pattern.permute.xlu1 %v536_v2  ;;  %533 = vset.pattern.permute.xlu0 %v536_v2  ;;  %v513_v3 = vld [vmem:[%s713_s1 + $0x30] sm:$0xff]  ;;  %v523_v5 = vld [vmem:[%s713_s1 + $0x80] sm:$0xff] }
   0x2   :  { %v522_v1 = vld [vmem:[%s713_s1 + $0x78] sm:$0xff]  ;;  %535 = vset.pattern.permute.xlu2 %v536_v2  ;;  %241 = vmatpush.bf16.msra.mxu0 %v514_v0  ;;  %v521_v4 = vld [vmem:[%s713_s1 + $0x70] sm:$0xff]  ;;  %v59_v7 = vld [vmem:[%s714_s2] sm:$0xff] }
   0x3   :  { %524 = vmatpush.bf16.msra.mxu3 %v514_v0  ;;  %264 = vmatpush.bf16.msra.mxu1 %v522_v1  ;;  %v61_v6 = vld [vmem:[%s714_s2 + $0x10] sm:$0xff]  ;;  %v406_v8 = vld [vmem:[%s715_s0 + $0x8] sm:$0xf]  ;;  %v62_v13 = vld [vmem:[%s714_s2 + $0x18] sm:$0xff] }
   0x4   :  { %76 = vperm.xlu1 %534, %v61_v6   ;;  %v503_v9 = vld [vmem:[%s715_s0 + $0x10] sm:$0xf0]  ;;  %294 = vmatpush.bf16.msra.mxu2 %v523_v5  ;;  %v512_v11 = vld [vmem:[%s713_s1 + $0x28] sm:$0xff]  ;;  %v511_v14 = vld [vmem:[%s713_s1 + $0x20] sm:$0xff] }
   0x5   :  { %66 = vperm.xlu0 %533, %v59_v7   ;;  %v407_v10 = vor.u32 %v503_v9, %v406_v8  ;;  %v520_v12 = vld [vmem:[%s713_s1 + $0x68] sm:$0xff]  ;;  %v519_v16 = vld [vmem:[%s713_s1 + $0x60] sm:$0xff]  ;;  %v510_v18 = vld [vmem:[%s713_s1 + $0x18] sm:$0xff] }
   0x6   :  { %242 = vmatpush.bf16.msra.mxu0 %v513_v3  ;;  %v60_v15 = vld [vmem:[%s714_s2 + $0x8] sm:$0xff]  ;;  %v63_v17 = vld [vmem:[%s714_s2 + $0x20] sm:$0xff]  ;;  %v518_v19 = vld [vmem:[%s713_s1 + $0x58] sm:$0xff] }
   0x7   :  { %525 = vmatpush.bf16.msra.mxu3 %v513_v3  ;;  %265 = vmatpush.bf16.msra.mxu1 %v521_v4  ;;  %v493_v20 = vld [vmem:[%s714_s2 + $0x38] sm:$0xff]  ;;  %v418_v21 = vld [vmem:[%s715_s0 + $0x20] sm:$0xf]  ;;  %v506_v22 = vld [vmem:[%s715_s0 + $0x28] sm:$0xf0] }
   0x8   :  { %488 = vmatmul.msk.bf16.vlgmr.msra.gmra.mxu2 %vm231_vm0, %v407_v10  ;;  %86 = vperm.xlu2 %535, %v63_v17   ;;  %v509_v23 = vld [vmem:[%s713_s1 + $0x10] sm:$0xff]  ;;  %v491_v25 = vld [vmem:[%s714_s2 + $0x28] sm:$0xff]  ;;  %v419_v27 = vor.u32 %v506_v22, %v418_v21  ;;  %v507_v30 = vld [vmem:[%s713_s1] sm:$0xff] }
   0x9   :  { %v492_v24 = vld [vmem:[%s714_s2 + $0x30] sm:$0xff]  ;;  %v508_v28 = vld [vmem:[%s713_s1 + $0x8] sm:$0xff]  ;;  %v398_v31 = vld [vmem:[%s715_s0] sm:$0xf] }
   0xa   :  { %243 = vmatpush.bf16.msra.mxu0 %v512_v11  ;;  %v517_v26 = vld [vmem:[%s713_s1 + $0x50] sm:$0xff]  ;;  %v516_v29 = vld [vmem:[%s713_s1 + $0x48] sm:$0xff]  ;;  %v494_v34 = vld [vmem:[%s714_s2 + $0x40] sm:$0xff] }
   0xb   :  { %526 = vmatpush.bf16.msra.mxu3 %v512_v11  ;;  %266 = vmatpush.bf16.msra.mxu1 %v520_v12  ;;  %v502_v32 = vld [vmem:[%s715_s0 + $0x8] sm:$0xf0]  ;;  %v496_v33 = vld [vmem:[%s714_s2 + $0x50] sm:$0xff]  ;;  %v410_v35 = vld [vmem:[%s715_s0 + $0x18] sm:$0xf] }
   0xc   :  { %81 = vperm.xlu1 %534, %v62_v13   ;;  %v505_v36 = vld [vmem:[%s715_s0 + $0x20] sm:$0xf0]  ;;  %v495_v37 = vld [vmem:[%s714_s2 + $0x48] sm:$0xff]  ;;  %v400_v40 = vld [vmem:[%s715_s0 + $0xc] sm:$0xf0]  ;;  %v399_v41 = vor.u32 %v502_v32, %v398_v31 }
   0xd   :  { %71 = vperm.xlu0 %533, %v60_v15   ;;  %v515_v38 = vld [vmem:[%s713_s1 + $0x40] sm:$0xff]  ;;  %v411_v42 = vor.u32 %v505_v36, %v410_v35  ;;  %v24_v43 = vld [vmem:[%s715_s0 + $0x38] sm:$0xf]  ;;  %v499_v46 = vld [vmem:[%s714_s2 + $0x68] sm:$0xff] }
   0xe   :  { %244 = vmatpush.bf16.msra.mxu0 %v511_v14  ;;  %v501_v39 = vld [vmem:[%s715_s0 + $0x4] sm:$0xf]  ;;  %v113_v45 = vunpack.c.l.b16 %v24_v43  ;;  %v497_v48 = vld [vmem:[%s714_s2 + $0x58] sm:$0xff]  ;;  %v23_v50 = vld [vmem:[%s715_s0 + $0x30] sm:$0xff] }
   0xf   :  { %527 = vmatpush.bf16.msra.mxu3 %v511_v14  ;;  %267 = vmatpush.bf16.msra.mxu1 %v519_v16  ;;  %v403_v44 = vor.u32 %v501_v39, %v400_v40  ;;  %v498_v47 = vld [vmem:[%s714_s2 + $0x60] sm:$0xff]  ;;  %v111_v51 = vunpack.c.l.b16 %v23_v50  ;;  %v500_v52 = vld [vmem:[%s714_s2 + $0x70] sm:$0xff]  ;;  %v504_v53 = vld [vmem:[%s715_s0 + $0x1c] sm:$0xf]  ;;  %v112_v57 = vunpack.c.h.b16 %v23_v50 }
  0x10   :  { %323 = vperm.xlu2 %535, %v491_v25   ;;  %v122_v49 = vpack.c.b16 %v113_v45, %v113_v45  ;;  %v412_v54 = vld [vmem:[%s715_s0 + $0x24] sm:$0xf0] }
  0x11   :  { %v120_v55 = vpack.c.b16 %v111_v51, %v111_v51  ;;  %v415_v56 = vor.u32 %v504_v53, %v412_v54  ;;  %v121_v58 = vpack.c.b16 %v112_v57, %v112_v57 }
  0x12   :  { %245 = vmatpush.bf16.msra.mxu0 %v510_v18 }
  0x13   :  { %528 = vmatpush.bf16.msra.mxu3 %v510_v18  ;;  %268 = vmatpush.bf16.msra.mxu1 %v518_v19 }
  0x14   :  { %333 = vperm.xlu1 %534, %v493_v20  }
  0x15   :  { %328 = vperm.xlu0 %533, %v492_v24  }
  0x16   :  { %246 = vmatpush.bf16.msra.mxu0 %v509_v23 }
  0x17   :  { %529 = vmatpush.bf16.msra.mxu3 %v509_v23  ;;  %269 = vmatpush.bf16.msra.mxu1 %v517_v26 }
  0x18   :  { %489 = vmatmul.msk.bf16.gmra.mxu2 %vm231_vm0, %v419_v27  ;;  %338 = vperm.xlu2 %535, %v494_v34  }
  0x1a   :  { %247 = vmatpush.bf16.msra.mxu0 %v508_v28 }
  0x1b   :  { %530 = vmatpush.bf16.msra.mxu3 %v508_v28  ;;  %270 = vmatpush.bf16.msra.mxu1 %v516_v29 }
  0x1c   :  { %359 = vperm.xlu1 %534, %v496_v33  }
  0x1d   :  { %343 = vperm.xlu0 %533, %v495_v37  }
  0x1e   :  { %248 = vmatpush.bf16.msra.mxu0 %v507_v30 }
  0x1f   :  { %531 = vmatpush.bf16.msra.mxu3 %v507_v30  ;;  %271 = vmatpush.bf16.msra.mxu1 %v515_v38 }
  0x20   :  { %364 = vperm.xlu2 %535, %v497_v48  }
  0x21   :  { %249 = vmatmul.bf16.vlgmr.msra.gmra.mxu0 %v399_v41 }
  0x22   :  { %254 = vmatmul.bf16.vlgmr.msra.gmra.mxu3 %v411_v42  ;;  %272 = vmatmul.bf16.vlgmr.msra.gmra.mxu1 %v403_v44 }
  0x24   :  { %374 = vperm.xlu1 %534, %v499_v46  }
  0x25   :  { %369 = vperm.xlu0 %533, %v498_v47  }
  0x28   :  { %490 = vmatmul.msk.bf16.gmra.mxu2 %vm231_vm0, %v122_v49  ;;  %379 = vperm.xlu2 %535, %v500_v52  }
  0x32   :  { %259 = vmatmul.bf16.gmra.mxu3 %v120_v55  ;;  %277 = vmatmul.bf16.gmra.mxu1 %v415_v56 }
  0x42   :  { %282 = vmatmul.bf16.gmra.mxu1 %v121_v58 }
  0x62   :  { %v87_v62 = vpop.permute.xlu2 %86 }
  0x6a   :  { %v324_v3 = vpop.permute.xlu2 %323 }
  0x72   :  { %v339_v14 = vpop.permute.xlu2 %338 }
  0x76   :  { %v77_v59 = vpop.permute.xlu1 %76 }
  0x77   :  { %v67_v61 = vpop.permute.xlu0 %66 }
  0x7a   :  { %v365_v30 = vpop.permute.xlu2 %364 }
  0x7e   :  { %v82_v0 = vpop.permute.xlu1 %81 }
  0x7f   :  { %v72_v1 = vpop.permute.xlu0 %71 }
  0x82   :  { %v380_v55 = vpop.permute.xlu2 %379 }
  0x86   :  { %v334_v4 = vpop.permute.xlu1 %333 }
  0x87   :  { %v329_v9 = vpop.permute.xlu0 %328 }
  0x8b   :  { %v296_v60 = vpop.f32.mrf.mxu2 }
  0x8e   :  { %v360_v19 = vpop.permute.xlu1 %359 }
  0x8f   :  { %v344_v25 = vpop.permute.xlu0 %343 }
  0x93   :  { %v298_v63 = vpop.f32.mrf.mxu2 }
  0x96   :  { %v375_v48 = vpop.permute.xlu1 %374 }
  0x97   :  { %v370_v39 = vpop.permute.xlu0 %369 }
  0x9b   :  { %v301_v2 = vpop.f32.mrf.mxu2 }
  0x9e   :  { %v250_v5 = vpop.f32.mrf.mxu0 }
  0x9f   :  { %v251_v6 = vadd.f32 %v250_v5, %v67_v61  ;;  %v273_v7 = vpop.f32.mrf.mxu1 }
  0xa1   :  { %v274_v8 = vadd.f32 %v273_v7, %v251_v6 }
  0xa3   :  { %v297_v10 = vadd.f32 %v296_v60, %v274_v8  ;;  %v303_v11 = vpop.f32.mrf.mxu2 }
  0xa5   :  { %v255_v12 = vpop.f32.mrf.mxu3  ;;  %v310_v13 = vmax.f32 %v297_v10, 0.0 }
  0xa6   :  { %v252_v15 = vpop.f32.mrf.mxu0  ;;  %v256_v27 = vadd.f32 %v255_v12, %v77_v59 }
  0xa7   :  { %v346_v16 = vmul.f32 %v324_v3, %v310_v13  ;;  %v253_v17 = vadd.f32 %v252_v15, %v72_v1  ;;  %v275_v18 = vpop.f32.mrf.mxu1 }
  0xa9   :  { %v382_v20 = vadd.f32 %v360_v19, %v346_v16  ;;  %v276_v21 = vadd.f32 %v275_v18, %v253_v17 }
  0xab   :  { %387 = vst [vmem:[%s716_s3] sm:$0xff] %v382_v20  ;;  %v299_v22 = vadd.f32 %v298_v63, %v276_v21  ;;  %v306_v23 = vpop.f32.mrf.mxu2 }
  0xad   :  { %v257_v24 = vpop.f32.mrf.mxu3  ;;  %v311_v26 = vmax.f32 %v299_v22, 0.0 }
  0xae   :  { %v258_v37 = vadd.f32 %v257_v24, %v82_v0 }
  0xaf   :  { %v347_v28 = vmul.f32 %v329_v9, %v311_v26  ;;  %v278_v29 = vpop.f32.mrf.mxu1 }
  0xb0   :  { %v279_v31 = vadd.f32 %v278_v29, %v256_v27 }
  0xb1   :  { %v383_v32 = vadd.f32 %v365_v30, %v347_v28 }
  0xb2   :  { %v302_v33 = vadd.f32 %v301_v2, %v279_v31 }
  0xb3   :  { %388 = vst [vmem:[%s716_s3 + $0x8] sm:$0xff] %v383_v32  ;;  %v308_v34 = vpop.f32.mrf.mxu2 }
  0xb4   :  { %v312_v35 = vmax.f32 %v302_v33, 0.0 }
  0xb5   :  { %v260_v36 = vpop.f32.mrf.mxu3 }
  0xb6   :  { %v348_v38 = vmul.f32 %v334_v4, %v312_v35  ;;  %v261_v46 = vadd.f32 %v260_v36, %v87_v62 }
  0xb7   :  { %v280_v40 = vpop.f32.mrf.mxu1 }
  0xb8   :  { %v384_v41 = vadd.f32 %v370_v39, %v348_v38  ;;  %v281_v42 = vadd.f32 %v280_v40, %v258_v37 }
  0xba   :  { %389 = vst [vmem:[%s716_s3 + $0x10] sm:$0xff] %v384_v41  ;;  %v304_v43 = vadd.f32 %v303_v11, %v281_v42 }
  0xbc   :  { %v313_v44 = vmax.f32 %v304_v43, 0.0 }
  0xbd   :  { %v262_v45 = vpop.f32.mrf.mxu3 }
  0xbe   :  { %v349_v47 = vmul.f32 %v339_v14, %v313_v44 }
  0xbf   :  { %v283_v49 = vpop.f32.mrf.mxu1 }
  0xc0   :  { %v385_v50 = vadd.f32 %v375_v48, %v349_v47  ;;  %v284_v51 = vadd.f32 %v283_v49, %v261_v46 }
  0xc2   :  { %390 = vst [vmem:[%s716_s3 + $0x18] sm:$0xff] %v385_v50  ;;  %v307_v52 = vadd.f32 %v306_v23, %v284_v51 }
  0xc4   :  { %v314_v53 = vmax.f32 %v307_v52, 0.0 }
  0xc6   :  { %v350_v54 = vmul.f32 %v344_v25, %v314_v53 }
  0xc7   :  { %v285_v56 = vpop.f32.mrf.mxu1 }
  0xc8   :  { %v386_v57 = vadd.f32 %v380_v55, %v350_v54 }
  0xca   :  { %391 = vst [vmem:[%s716_s3 + $0x20] sm:$0xff] %v386_v57 }

// kernel: openunmix_forward.12
= control target key start
LH: loop header
LB: loop body
LE: loop exit
PB: predicated region body
PF: predicated region fallthrough
CT: control target
= control target key end

     0   :  { %v562_v3 = vmov 0   ;;  %vm261_vm0 = vcmask 916480   ;;  %s738_s1 = inlined_call_operand.vmem [shape: bf16[368,128], index: 1, kind: input, shape index: {}]   ;;  %s739_s2 = inlined_call_operand.vmem [shape: f32[3,32,1], index: 2, kind: input, shape index: {}]   ;;  %s740_s0 = inlined_call_operand.vmem [shape: bf16[32,368], index: 0, kind: input, shape index: {}]   ;;  %s741_s3 = inlined_call_operand.vmem [shape: f32[32,128], index: 3, kind: output, shape index: {}]  }
   0x1   :  { %v534_v0 = vld [vmem:[%s738_s1 + $0x38] sm:$0xff]  ;;  %v549_v2 = vld [vmem:[%s738_s1 + $0xb0] sm:$0xff]  ;;  %560 = vset.pattern.permute.xlu1 %v562_v3  ;;  %559 = vset.pattern.permute.xlu0 %v562_v3  ;;  %v548_v6 = vld [vmem:[%s738_s1 + $0xa8] sm:$0xff] }
   0x2   :  { %v542_v1 = vld [vmem:[%s738_s1 + $0x78] sm:$0xff]  ;;  %561 = vset.pattern.permute.xlu2 %v562_v3  ;;  %268 = vmatpush.bf16.msra.mxu0 %v534_v0  ;;  %v533_v4 = vld [vmem:[%s738_s1 + $0x30] sm:$0xff]  ;;  %v532_v7 = vld [vmem:[%s738_s1 + $0x28] sm:$0xff] }
   0x3   :  { %550 = vmatpush.bf16.msra.mxu3 %v534_v0  ;;  %287 = vmatpush.bf16.msra.mxu1 %v542_v1  ;;  %v541_v5 = vld [vmem:[%s738_s1 + $0x70] sm:$0xff]  ;;  %v540_v8 = vld [vmem:[%s738_s1 + $0x68] sm:$0xff]  ;;  %v547_v9 = vld [vmem:[%s738_s1 + $0xa0] sm:$0xff] }
   0x4   :  { %307 = vmatpush.bf16.msra.mxu2 %v549_v2  ;;  %v71_v10 = vld [vmem:[%s739_s2 + $0x10] sm:$0xff]  ;;  %v69_v11 = vld [vmem:[%s739_s2] sm:$0xff]  ;;  %v546_v14 = vld [vmem:[%s738_s1 + $0x98] sm:$0xff] }
   0x5   :  { %85 = vperm.xlu1 %560, %v71_v10   ;;  %75 = vperm.xlu0 %559, %v69_v11   ;;  %v531_v12 = vld [vmem:[%s738_s1 + $0x20] sm:$0xff]  ;;  %v72_v15 = vld [vmem:[%s739_s2 + $0x18] sm:$0xff]  ;;  %v70_v16 = vld [vmem:[%s739_s2 + $0x8] sm:$0xff] }
   0x6   :  { %269 = vmatpush.bf16.msra.mxu0 %v533_v4  ;;  %v539_v13 = vld [vmem:[%s738_s1 + $0x60] sm:$0xff]  ;;  %v530_v17 = vld [vmem:[%s738_s1 + $0x18] sm:$0xff]  ;;  %v545_v19 = vld [vmem:[%s738_s1 + $0x90] sm:$0xff] }
   0x7   :  { %551 = vmatpush.bf16.msra.mxu3 %v533_v4  ;;  %288 = vmatpush.bf16.msra.mxu1 %v541_v5  ;;  %v538_v18 = vld [vmem:[%s738_s1 + $0x58] sm:$0xff]  ;;  %v529_v20 = vld [vmem:[%s738_s1 + $0x10] sm:$0xff]  ;;  %v513_v21 = vld [vmem:[%s739_s2 + $0x20] sm:$0xff] }
   0x8   :  { %308 = vmatpush.bf16.msra.mxu2 %v548_v6  ;;  %v537_v22 = vld [vmem:[%s738_s1 + $0x50] sm:$0xff]  ;;  %v544_v23 = vld [vmem:[%s738_s1 + $0x88] sm:$0xff]  ;;  %336 = vperm.xlu2 %561, %v513_v21   ;;  %v516_v24 = vld [vmem:[%s739_s2 + $0x38] sm:$0xff] }
   0x9   :  { %v515_v25 = vld [vmem:[%s739_s2 + $0x30] sm:$0xff]  ;;  %v528_v26 = vld [vmem:[%s738_s1 + $0x8] sm:$0xff]  ;;  %v543_v28 = vld [vmem:[%s738_s1 + $0x80] sm:$0xff] }
   0xa   :  { %270 = vmatpush.bf16.msra.mxu0 %v532_v7  ;;  %v536_v27 = vld [vmem:[%s738_s1 + $0x48] sm:$0xff]  ;;  %v523_v30 = vld [vmem:[%s740_s0 + $0x10] sm:$0xf0]  ;;  %v527_v31 = vld [vmem:[%s738_s1] sm:$0xff] }
   0xb   :  { %552 = vmatpush.bf16.msra.mxu3 %v532_v7  ;;  %289 = vmatpush.bf16.msra.mxu1 %v540_v8  ;;  %v405_v29 = vld [vmem:[%s740_s0 + $0x8] sm:$0xf]  ;;  %v535_v32 = vld [vmem:[%s738_s1 + $0x40] sm:$0xff]  ;;  %v522_v36 = vld [vmem:[%s740_s0 + $0x8] sm:$0xf0] }
   0xc   :  { %309 = vmatpush.bf16.msra.mxu2 %v547_v9  ;;  %v514_v33 = vld [vmem:[%s739_s2 + $0x28] sm:$0xff]  ;;  %v406_v34 = vor.u32 %v523_v30, %v405_v29  ;;  %v397_v35 = vld [vmem:[%s740_s0] sm:$0xf]  ;;  %v409_v37 = vld [vmem:[%s740_s0 + $0x18] sm:$0xf] }
   0xd   :  { %90 = vperm.xlu1 %560, %v72_v15   ;;  %80 = vperm.xlu0 %559, %v70_v16   ;;  %v525_v38 = vld [vmem:[%s740_s0 + $0x20] sm:$0xf0]  ;;  %v399_v40 = vld [vmem:[%s740_s0 + $0xc] sm:$0xf0]  ;;  %v398_v41 = vor.u32 %v522_v36, %v397_v35  ;;  %v518_v43 = vld [vmem:[%s739_s2 + $0x48] sm:$0xff] }
   0xe   :  { %271 = vmatpush.bf16.msra.mxu0 %v531_v12  ;;  %v521_v39 = vld [vmem:[%s740_s0 + $0x4] sm:$0xf]  ;;  %v519_v42 = vld [vmem:[%s739_s2 + $0x50] sm:$0xff]  ;;  %v410_v44 = vor.u32 %v525_v38, %v409_v37  ;;  %v417_v47 = vld [vmem:[%s740_s0 + $0x20] sm:$0xf] }
   0xf   :  { %553 = vmatpush.bf16.msra.mxu3 %v531_v12  ;;  %290 = vmatpush.bf16.msra.mxu1 %v539_v13  ;;  %v402_v45 = vor.u32 %v521_v39, %v399_v40  ;;  %v517_v46 = vld [vmem:[%s739_s2 + $0x40] sm:$0xff]  ;;  %v526_v48 = vld [vmem:[%s740_s0 + $0x28] sm:$0xf0]  ;;  %v520_v49 = vld [vmem:[%s739_s2 + $0x58] sm:$0xff] }
  0x10   :  { %310 = vmatpush.bf16.msra.mxu2 %v546_v14  ;;  %341 = vperm.xlu2 %561, %v514_v33   ;;  %v418_v50 = vor.u32 %v526_v48, %v417_v47  ;;  %v524_v51 = vld [vmem:[%s740_s0 + $0x1c] sm:$0xf]  ;;  %v411_v52 = vld [vmem:[%s740_s0 + $0x24] sm:$0xf0] }
  0x11   :  { %v414_v53 = vor.u32 %v524_v51, %v411_v52 }
  0x12   :  { %272 = vmatpush.bf16.msra.mxu0 %v530_v17 }
  0x13   :  { %554 = vmatpush.bf16.msra.mxu3 %v530_v17  ;;  %291 = vmatpush.bf16.msra.mxu1 %v538_v18 }
  0x14   :  { %311 = vmatpush.bf16.msra.mxu2 %v545_v19 }
  0x15   :  { %351 = vperm.xlu1 %560, %v516_v24   ;;  %346 = vperm.xlu0 %559, %v515_v25  }
  0x16   :  { %273 = vmatpush.bf16.msra.mxu0 %v529_v20 }
  0x17   :  { %555 = vmatpush.bf16.msra.mxu3 %v529_v20  ;;  %292 = vmatpush.bf16.msra.mxu1 %v537_v22 }
  0x18   :  { %312 = vmatpush.bf16.msra.mxu2 %v544_v23  ;;  %365 = vperm.xlu2 %561, %v517_v46  }
  0x1a   :  { %274 = vmatpush.bf16.msra.mxu0 %v528_v26 }
  0x1b   :  { %556 = vmatpush.bf16.msra.mxu3 %v528_v26  ;;  %293 = vmatpush.bf16.msra.mxu1 %v536_v27 }
  0x1c   :  { %313 = vmatpush.bf16.msra.mxu2 %v543_v28 }
  0x1d   :  { %375 = vperm.xlu1 %560, %v519_v42   ;;  %370 = vperm.xlu0 %559, %v518_v43  }
  0x1e   :  { %275 = vmatpush.bf16.msra.mxu0 %v527_v31 }
  0x1f   :  { %511 = vmatmul.msk.bf16.vlgmr.msra.gmra.mxu2 %vm261_vm0, %v406_v34  ;;  %557 = vmatpush.bf16.msra.mxu3 %v527_v31 }
  0x20   :  { %294 = vmatpush.bf16.msra.mxu1 %v535_v32  ;;  %380 = vperm.xlu2 %561, %v520_v49  }
  0x21   :  { %276 = vmatmul.bf16.vlgmr.msra.gmra.mxu0 %v398_v41 }
  0x22   :  { %281 = vmatmul.bf16.vlgmr.msra.gmra.mxu3 %v410_v44 }
  0x23   :  { %295 = vmatmul.bf16.vlgmr.msra.gmra.mxu1 %v402_v45 }
  0x2f   :  { %512 = vmatmul.msk.bf16.gmra.mxu2 %vm261_vm0, %v418_v50 }
  0x33   :  { %300 = vmatmul.bf16.gmra.mxu1 %v414_v53 }
  0x62   :  { %v337_v55 = vpop.permute.xlu2 %336 }
  0x6a   :  { %v342_v58 = vpop.permute.xlu2 %341 }
  0x72   :  { %v366_v8 = vpop.permute.xlu2 %365 }
  0x77   :  { %v76_v54 = vpop.permute.xlu0 %75  ;;  %v86_v56 = vpop.permute.xlu1 %85 }
  0x7a   :  { %v381_v36 = vpop.permute.xlu2 %380 }
  0x7f   :  { %v81_v57 = vpop.permute.xlu0 %80  ;;  %v91_v0 = vpop.permute.xlu1 %90 }
  0x87   :  { %v347_v3 = vpop.permute.xlu0 %346  ;;  %v352_v14 = vpop.permute.xlu1 %351 }
  0x8f   :  { %v371_v19 = vpop.permute.xlu0 %370  ;;  %v376_v28 = vpop.permute.xlu1 %375 }
  0x9e   :  { %v277_v59 = vpop.f32.mrf.mxu0 }
  0x9f   :  { %v278_v60 = vadd.f32 %v277_v59, %v76_v54 }
  0xa0   :  { %v296_v61 = vpop.f32.mrf.mxu1 }
  0xa1   :  { %v297_v62 = vadd.f32 %v296_v61, %v278_v60 }
  0xa2   :  { %v315_v63 = vpop.f32.mrf.mxu2 }
  0xa3   :  { %v316_v1 = vadd.f32 %v315_v63, %v297_v62 }
  0xa5   :  { %v325_v2 = vmax.f32 %v316_v1, 0.0  ;;  %v282_v10 = vpop.f32.mrf.mxu3 }
  0xa6   :  { %v279_v4 = vpop.f32.mrf.mxu0  ;;  %v283_v16 = vadd.f32 %v282_v10, %v86_v56 }
  0xa7   :  { %v354_v5 = vmul.f32 %v337_v55, %v325_v2  ;;  %v280_v6 = vadd.f32 %v279_v4, %v81_v57 }
  0xa8   :  { %v298_v7 = vpop.f32.mrf.mxu1 }
  0xa9   :  { %v383_v9 = vadd.f32 %v366_v8, %v354_v5  ;;  %v299_v11 = vadd.f32 %v298_v7, %v280_v6 }
  0xaa   :  { %v317_v12 = vpop.f32.mrf.mxu2 }
  0xab   :  { %387 = vst [vmem:[%s741_s3] sm:$0xff] %v383_v9  ;;  %v318_v13 = vadd.f32 %v317_v12, %v299_v11 }
  0xad   :  { %v326_v15 = vmax.f32 %v318_v13, 0.0  ;;  %v284_v24 = vpop.f32.mrf.mxu3 }
  0xae   :  { %v285_v26 = vadd.f32 %v284_v24, %v91_v0 }
  0xaf   :  { %v355_v17 = vmul.f32 %v342_v58, %v326_v15 }
  0xb0   :  { %v301_v18 = vpop.f32.mrf.mxu1 }
  0xb1   :  { %v302_v20 = vadd.f32 %v301_v18, %v283_v16  ;;  %v384_v21 = vadd.f32 %v371_v19, %v355_v17 }
  0xb2   :  { %v320_v22 = vpop.f32.mrf.mxu2 }
  0xb3   :  { %v321_v23 = vadd.f32 %v320_v22, %v302_v20  ;;  %388 = vst [vmem:[%s741_s3 + $0x8] sm:$0xff] %v384_v21 }
  0xb5   :  { %v327_v25 = vmax.f32 %v321_v23, 0.0 }
  0xb7   :  { %v356_v27 = vmul.f32 %v347_v3, %v327_v25 }
  0xb8   :  { %v303_v29 = vpop.f32.mrf.mxu1 }
  0xb9   :  { %v385_v30 = vadd.f32 %v376_v28, %v356_v27  ;;  %v304_v31 = vadd.f32 %v303_v29, %v285_v26 }
  0xba   :  { %v322_v32 = vpop.f32.mrf.mxu2 }
  0xbb   :  { %389 = vst [vmem:[%s741_s3 + $0x10] sm:$0xff] %v385_v30  ;;  %v323_v33 = vadd.f32 %v322_v32, %v304_v31 }
  0xbd   :  { %v328_v34 = vmax.f32 %v323_v33, 0.0 }
  0xbf   :  { %v357_v35 = vmul.f32 %v352_v14, %v328_v34 }
  0xc1   :  { %v386_v37 = vadd.f32 %v381_v36, %v357_v35 }
  0xc3   :  { %390 = vst [vmem:[%s741_s3 + $0x18] sm:$0xff] %v386_v37 }

// kernel: openunmix_forward.13
= control target key start
LH: loop header
LB: loop body
LE: loop exit
PB: predicated region body
PF: predicated region fallthrough
CT: control target
= control target key end

     0   :  { %v435_v2 = vmov 0   ;;  %vm200_vm0 = vcmask 130048   ;;  %s569_s1 = inlined_call_operand.vmem [shape: bf16[272,128], index: 1, kind: input, shape index: {}]   ;;  %s570_s0 = inlined_call_operand.vmem [shape: bf16[24,272], index: 0, kind: input, shape index: {}]   ;;  %s571_s2 = inlined_call_operand.vmem [shape: f32[3,24,1], index: 2, kind: input, shape index: {}]   ;;  %s572_s3 = inlined_call_operand.vmem [shape: f32[24,128], index: 3, kind: output, shape index: {}]  }
   0x1   :  { %v413_v0 = vld [vmem:[%s569_s1 + $0x38] sm:$0xff]  ;;  %432 = vset.pattern.permute.xlu0 %v435_v2  ;;  %433 = vset.pattern.permute.xlu1 %v435_v2  ;;  %v412_v3 = vld [vmem:[%s569_s1 + $0x30] sm:$0xff]  ;;  %v422_v5 = vld [vmem:[%s569_s1 + $0x80] sm:$0xff] }
   0x2   :  { %v421_v1 = vld [vmem:[%s569_s1 + $0x78] sm:$0xff]  ;;  %434 = vset.pattern.permute.xlu2 %v435_v2  ;;  %207 = vmatpush.bf16.msra.mxu0 %v413_v0  ;;  %v420_v4 = vld [vmem:[%s569_s1 + $0x70] sm:$0xff]  ;;  %v325_v6 = vld [vmem:[%s570_s0 + $0x8] sm:$0xf] }
   0x3   :  { %423 = vmatpush.bf16.msra.mxu3 %v413_v0  ;;  %225 = vmatpush.bf16.msra.mxu1 %v421_v1  ;;  %v405_v7 = vld [vmem:[%s570_s0 + $0x10] sm:$0xf0]  ;;  %v411_v9 = vld [vmem:[%s569_s1 + $0x28] sm:$0xff]  ;;  %v55_v11 = vld [vmem:[%s571_s2] sm:$0xff] }
   0x4   :  { %250 = vmatpush.bf16.msra.mxu2 %v422_v5  ;;  %v326_v8 = vor.u32 %v405_v7, %v325_v6  ;;  %v419_v10 = vld [vmem:[%s569_s1 + $0x68] sm:$0xff]  ;;  %v57_v12 = vld [vmem:[%s571_s2 + $0x10] sm:$0xff]  ;;  %60 = vperm.xlu0 %432, %v55_v11   ;;  %v410_v13 = vld [vmem:[%s569_s1 + $0x20] sm:$0xff] }
   0x5   :  { %70 = vperm.xlu1 %433, %v57_v12   ;;  %v418_v14 = vld [vmem:[%s569_s1 + $0x60] sm:$0xff]  ;;  %v409_v16 = vld [vmem:[%s569_s1 + $0x18] sm:$0xff]  ;;  %v56_v17 = vld [vmem:[%s571_s2 + $0x8] sm:$0xff] }
   0x6   :  { %208 = vmatpush.bf16.msra.mxu0 %v412_v3  ;;  %v20_v15 = vld [vmem:[%s570_s0 + $0x20] sm:$0xf]  ;;  %v397_v18 = vld [vmem:[%s571_s2 + $0x18] sm:$0xff]  ;;  %v408_v21 = vld [vmem:[%s569_s1 + $0x10] sm:$0xff] }
   0x7   :  { %424 = vmatpush.bf16.msra.mxu3 %v412_v3  ;;  %226 = vmatpush.bf16.msra.mxu1 %v420_v4  ;;  %v417_v19 = vld [vmem:[%s569_s1 + $0x58] sm:$0xff]  ;;  %v87_v20 = vunpack.c.l.b16 %v20_v15  ;;  %v398_v22 = vld [vmem:[%s571_s2 + $0x20] sm:$0xff]  ;;  %v416_v23 = vld [vmem:[%s569_s1 + $0x50] sm:$0xff] }
   0x8   :  { %395 = vmatmul.msk.bf16.vlgmr.msra.gmra.mxu2 %vm200_vm0, %v326_v8  ;;  %275 = vperm.xlu2 %434, %v398_v22   ;;  %v407_v25 = vld [vmem:[%s569_s1 + $0x8] sm:$0xff]  ;;  %v19_v26 = vld [vmem:[%s570_s0 + $0x18] sm:$0xff]  ;;  %v400_v27 = vld [vmem:[%s571_s2 + $0x30] sm:$0xff] }
   0x9   :  { %v93_v24 = vpack.c.b16 %v87_v20, %v87_v20  ;;  %v401_v28 = vld [vmem:[%s571_s2 + $0x38] sm:$0xff]  ;;  %v415_v29 = vld [vmem:[%s569_s1 + $0x48] sm:$0xff]  ;;  %v85_v31 = vunpack.c.l.b16 %v19_v26  ;;  %v406_v32 = vld [vmem:[%s569_s1] sm:$0xff]  ;;  %v86_v42 = vunpack.c.h.b16 %v19_v26 }
   0xa   :  { %209 = vmatpush.bf16.msra.mxu0 %v411_v9  ;;  %v399_v30 = vld [vmem:[%s571_s2 + $0x28] sm:$0xff]  ;;  %v317_v33 = vld [vmem:[%s570_s0] sm:$0xf]  ;;  %v403_v36 = vld [vmem:[%s570_s0 + $0x4] sm:$0xf] }
   0xb   :  { %425 = vmatpush.bf16.msra.mxu3 %v411_v9  ;;  %227 = vmatpush.bf16.msra.mxu1 %v419_v10  ;;  %v404_v34 = vld [vmem:[%s570_s0 + $0x8] sm:$0xf0]  ;;  %v414_v35 = vld [vmem:[%s569_s1 + $0x40] sm:$0xff]  ;;  %v319_v37 = vld [vmem:[%s570_s0 + $0xc] sm:$0xf0]  ;;  %v91_v39 = vpack.c.b16 %v85_v31, %v85_v31  ;;  %v92_v43 = vpack.c.b16 %v86_v42, %v86_v42 }
   0xc   :  { %65 = vperm.xlu0 %432, %v56_v17   ;;  %v318_v38 = vor.u32 %v404_v34, %v317_v33  ;;  %v322_v40 = vor.u32 %v403_v36, %v319_v37  ;;  %v402_v41 = vld [vmem:[%s571_s2 + $0x40] sm:$0xff] }
   0xd   :  { %270 = vperm.xlu1 %433, %v397_v18  }
   0xe   :  { %210 = vmatpush.bf16.msra.mxu0 %v410_v13 }
   0xf   :  { %426 = vmatpush.bf16.msra.mxu3 %v410_v13  ;;  %228 = vmatpush.bf16.msra.mxu1 %v418_v14 }
  0x10   :  { %280 = vperm.xlu2 %434, %v399_v30  }
  0x12   :  { %211 = vmatpush.bf16.msra.mxu0 %v409_v16 }
  0x13   :  { %427 = vmatpush.bf16.msra.mxu3 %v409_v16  ;;  %229 = vmatpush.bf16.msra.mxu1 %v417_v19 }
  0x14   :  { %292 = vperm.xlu0 %432, %v400_v27  }
  0x15   :  { %297 = vperm.xlu1 %433, %v401_v28  }
  0x16   :  { %212 = vmatpush.bf16.msra.mxu0 %v408_v21 }
  0x17   :  { %428 = vmatpush.bf16.msra.mxu3 %v408_v21  ;;  %230 = vmatpush.bf16.msra.mxu1 %v416_v23 }
  0x18   :  { %396 = vmatmul.msk.bf16.gmra.mxu2 %vm200_vm0, %v93_v24  ;;  %302 = vperm.xlu2 %434, %v402_v41  }
  0x1a   :  { %213 = vmatpush.bf16.msra.mxu0 %v407_v25 }
  0x1b   :  { %429 = vmatpush.bf16.msra.mxu3 %v407_v25  ;;  %231 = vmatpush.bf16.msra.mxu1 %v415_v29 }
  0x1e   :  { %214 = vmatpush.bf16.msra.mxu0 %v406_v32 }
  0x1f   :  { %430 = vmatpush.bf16.msra.mxu3 %v406_v32  ;;  %232 = vmatpush.bf16.msra.mxu1 %v414_v35 }
  0x21   :  { %215 = vmatmul.bf16.vlgmr.msra.gmra.mxu0 %v318_v38 }
  0x22   :  { %220 = vmatmul.bf16.vlgmr.msra.gmra.mxu3 %v91_v39  ;;  %233 = vmatmul.bf16.vlgmr.msra.gmra.mxu1 %v322_v40 }
  0x32   :  { %238 = vmatmul.bf16.gmra.mxu1 %v92_v43 }
  0x62   :  { %v276_v54 = vpop.permute.xlu2 %275 }
  0x6a   :  { %v281_v5 = vpop.permute.xlu2 %280 }
  0x72   :  { %v303_v16 = vpop.permute.xlu2 %302 }
  0x76   :  { %v61_v46 = vpop.permute.xlu0 %60 }
  0x77   :  { %v71_v48 = vpop.permute.xlu1 %70 }
  0x7e   :  { %v66_v49 = vpop.permute.xlu0 %65 }
  0x7f   :  { %v271_v59 = vpop.permute.xlu1 %270 }
  0x86   :  { %v293_v0 = vpop.permute.xlu0 %292 }
  0x87   :  { %v298_v10 = vpop.permute.xlu1 %297 }
  0x8b   :  { %v252_v44 = vpop.f32.mrf.mxu2 }
  0x93   :  { %v254_v45 = vpop.f32.mrf.mxu2 }
  0x9b   :  { %v257_v47 = vpop.f32.mrf.mxu2 }
  0x9e   :  { %v216_v50 = vpop.f32.mrf.mxu0 }
  0x9f   :  { %v217_v51 = vadd.f32 %v216_v50, %v61_v46  ;;  %v234_v52 = vpop.f32.mrf.mxu1 }
  0xa1   :  { %v235_v53 = vadd.f32 %v234_v52, %v217_v51 }
  0xa3   :  { %v253_v55 = vadd.f32 %v252_v44, %v235_v53  ;;  %v259_v56 = vpop.f32.mrf.mxu2 }
  0xa5   :  { %v221_v57 = vpop.f32.mrf.mxu3  ;;  %v261_v58 = vmax.f32 %v253_v55, 0.0 }
  0xa6   :  { %v218_v60 = vpop.f32.mrf.mxu0  ;;  %v222_v7 = vadd.f32 %v221_v57, %v71_v48 }
  0xa7   :  { %v283_v61 = vmul.f32 %v271_v59, %v261_v58  ;;  %v219_v62 = vadd.f32 %v218_v60, %v66_v49  ;;  %v236_v63 = vpop.f32.mrf.mxu1 }
  0xa9   :  { %v305_v1 = vadd.f32 %v293_v0, %v283_v61  ;;  %v237_v2 = vadd.f32 %v236_v63, %v219_v62 }
  0xab   :  { %308 = vst [vmem:[%s572_s3] sm:$0xff] %v305_v1  ;;  %v255_v3 = vadd.f32 %v254_v45, %v237_v2 }
  0xad   :  { %v223_v4 = vpop.f32.mrf.mxu3  ;;  %v262_v6 = vmax.f32 %v255_v3, 0.0 }
  0xaf   :  { %v284_v8 = vmul.f32 %v276_v54, %v262_v6  ;;  %v239_v9 = vpop.f32.mrf.mxu1 }
  0xb0   :  { %v240_v11 = vadd.f32 %v239_v9, %v222_v7 }
  0xb1   :  { %v306_v12 = vadd.f32 %v298_v10, %v284_v8 }
  0xb2   :  { %v258_v13 = vadd.f32 %v257_v47, %v240_v11 }
  0xb3   :  { %309 = vst [vmem:[%s572_s3 + $0x8] sm:$0xff] %v306_v12 }
  0xb4   :  { %v263_v14 = vmax.f32 %v258_v13, 0.0 }
  0xb6   :  { %v285_v15 = vmul.f32 %v281_v5, %v263_v14 }
  0xb7   :  { %v241_v17 = vpop.f32.mrf.mxu1 }
  0xb8   :  { %v307_v18 = vadd.f32 %v303_v16, %v285_v15 }
  0xba   :  { %310 = vst [vmem:[%s572_s3 + $0x10] sm:$0xff] %v307_v18 }

// kernel: openunmix_forward.14
= control target key start
LH: loop header
LB: loop body
LE: loop exit
PB: predicated region body
PF: predicated region fallthrough
CT: control target
= control target key end

     0   :  { %v269_v0 = vmov 0   ;;  %vm95_vm0 = vcmask 523264   ;;  %s371_s2 = inlined_call_operand.vmem [shape: f32[3,40,1], index: 2, kind: input, shape index: {}]   ;;  %s372_s1 = inlined_call_operand.vmem [shape: bf16[64,128], index: 1, kind: input, shape index: {}]   ;;  %s373_s0 = inlined_call_operand.vmem [shape: bf16[40,64], index: 0, kind: input, shape index: {}]   ;;  %s374_s3 = inlined_call_operand.vmem [shape: f32[40,128], index: 3, kind: output, shape index: {}]  }
   0x1   :  { %267 = vset.pattern.permute.xlu1 %v269_v0  ;;  %266 = vset.pattern.permute.xlu0 %v269_v0  ;;  %v30_v1 = vld [vmem:[%s371_s2 + $0x10] sm:$0xff]  ;;  %v28_v2 = vld [vmem:[%s371_s2] sm:$0xff]  ;;  %v256_v4 = vld [vmem:[%s372_s1 + $0x18] sm:$0xff] }
   0x2   :  { %v32_v3 = vld [vmem:[%s371_s2 + $0x20] sm:$0xff]  ;;  %45 = vperm.xlu1 %267, %v30_v1   ;;  %35 = vperm.xlu0 %266, %v28_v2   ;;  %v255_v5 = vld [vmem:[%s372_s1 + $0x10] sm:$0xff]  ;;  %v31_v6 = vld [vmem:[%s371_s2 + $0x18] sm:$0xff] }
   0x3   :  { %268 = vset.pattern.permute.xlu2 %v269_v0  ;;  %109 = vmatpush.bf16.msra.mxu0 %v256_v4  ;;  %v29_v7 = vld [vmem:[%s371_s2 + $0x8] sm:$0xff]  ;;  %v19_v10 = vld [vmem:[%s373_s0 + $0x10] sm:$0xf]  ;;  %v253_v11 = vld [vmem:[%s372_s1] sm:$0xff] }
   0x4   :  { %55 = vperm.xlu2 %268, %v32_v3   ;;  %257 = vmatpush.bf16.msra.mxu1 %v256_v4  ;;  %v254_v8 = vld [vmem:[%s372_s1 + $0x8] sm:$0xff]  ;;  %v67_v12 = vunpack.c.l.b16 %v19_v10  ;;  %v243_v13 = vld [vmem:[%s371_s2 + $0x38] sm:$0xff]  ;;  %v242_v14 = vld [vmem:[%s371_s2 + $0x30] sm:$0xff] }
   0x5   :  { %258 = vmatpush.bf16.msra.mxu2 %v256_v4  ;;  %v241_v9 = vld [vmem:[%s371_s2 + $0x28] sm:$0xff]  ;;  %v251_v15 = vld [vmem:[%s373_s0] sm:$0xff]  ;;  %v246_v19 = vld [vmem:[%s371_s2 + $0x50] sm:$0xff] }
   0x6   :  { %v252_v16 = vld [vmem:[%s373_s0 + $0x8] sm:$0xff]  ;;  %v70_v17 = vpack.c.b16 %v67_v12, %v67_v12  ;;  %v244_v18 = vld [vmem:[%s371_s2 + $0x40] sm:$0xff]  ;;  %v247_v21 = vld [vmem:[%s371_s2 + $0x58] sm:$0xff] }
   0x7   :  { %110 = vmatpush.bf16.msra.mxu0 %v255_v5  ;;  %v245_v20 = vld [vmem:[%s371_s2 + $0x48] sm:$0xff]  ;;  %v248_v23 = vld [vmem:[%s371_s2 + $0x60] sm:$0xff]  ;;  %v250_v24 = vld [vmem:[%s371_s2 + $0x70] sm:$0xff] }
   0x8   :  { %259 = vmatpush.bf16.msra.mxu1 %v255_v5  ;;  %v249_v22 = vld [vmem:[%s371_s2 + $0x68] sm:$0xff] }
   0x9   :  { %260 = vmatpush.bf16.msra.mxu2 %v255_v5 }
   0xa   :  { %50 = vperm.xlu1 %267, %v31_v6   ;;  %40 = vperm.xlu0 %266, %v29_v7  }
   0xb   :  { %111 = vmatpush.bf16.msra.mxu0 %v254_v8 }
   0xc   :  { %141 = vperm.xlu2 %268, %v241_v9   ;;  %261 = vmatpush.bf16.msra.mxu1 %v254_v8 }
   0xd   :  { %262 = vmatpush.bf16.msra.mxu2 %v254_v8 }
   0xf   :  { %112 = vmatpush.bf16.msra.mxu0 %v253_v11 }
  0x10   :  { %263 = vmatpush.bf16.msra.mxu1 %v253_v11 }
  0x11   :  { %264 = vmatpush.bf16.msra.mxu2 %v253_v11 }
  0x12   :  { %151 = vperm.xlu1 %267, %v243_v13   ;;  %146 = vperm.xlu0 %266, %v242_v14  }
  0x13   :  { %238 = vmatmul.msk.bf16.vlgmr.msra.gmra.mxu0 %vm95_vm0, %v251_v15  ;;  %239 = vmatmul.msk.bf16.vlgmr.msra.gmra.mxu1 %vm95_vm0, %v252_v16 }
  0x14   :  { %240 = vmatmul.msk.bf16.vlgmr.msra.gmra.mxu2 %vm95_vm0, %v70_v17  ;;  %156 = vperm.xlu2 %268, %v244_v18  }
  0x1a   :  { %177 = vperm.xlu1 %267, %v246_v19   ;;  %161 = vperm.xlu0 %266, %v245_v20  }
  0x1c   :  { %182 = vperm.xlu2 %268, %v247_v21  }
  0x22   :  { %192 = vperm.xlu1 %267, %v249_v22   ;;  %187 = vperm.xlu0 %266, %v248_v23  }
  0x24   :  { %197 = vperm.xlu2 %268, %v250_v24  }
  0x5e   :  { %v56_v26 = vpop.permute.xlu2 %55 }
  0x66   :  { %v142_v29 = vpop.permute.xlu2 %141 }
  0x6e   :  { %v157_v32 = vpop.permute.xlu2 %156 }
  0x74   :  { %v36_v25 = vpop.permute.xlu0 %35  ;;  %v46_v27 = vpop.permute.xlu1 %45 }
  0x76   :  { %v183_v39 = vpop.permute.xlu2 %182 }
  0x7c   :  { %v41_v28 = vpop.permute.xlu0 %40  ;;  %v51_v30 = vpop.permute.xlu1 %50 }
  0x7e   :  { %v198_v58 = vpop.permute.xlu2 %197 }
  0x84   :  { %v147_v31 = vpop.permute.xlu0 %146  ;;  %v152_v33 = vpop.permute.xlu1 %151 }
  0x8c   :  { %v162_v34 = vpop.permute.xlu0 %161  ;;  %v178_v42 = vpop.permute.xlu1 %177 }
  0x90   :  { %v114_v35 = vpop.f32.mrf.mxu0  ;;  %v119_v37 = vpop.f32.mrf.mxu1 }
  0x91   :  { %v115_v36 = vadd.f32 %v114_v35, %v36_v25  ;;  %v120_v38 = vadd.f32 %v119_v37, %v46_v27 }
  0x93   :  { %v128_v40 = vmax.f32 %v115_v36, 0.0  ;;  %v130_v41 = vmax.f32 %v120_v38, 0.0 }
  0x94   :  { %v188_v44 = vpop.permute.xlu0 %187  ;;  %v193_v62 = vpop.permute.xlu1 %192 }
  0x95   :  { %v164_v43 = vmul.f32 %v142_v29, %v128_v40  ;;  %v166_v45 = vmul.f32 %v152_v33, %v130_v41 }
  0x97   :  { %v200_v46 = vadd.f32 %v178_v42, %v164_v43  ;;  %v124_v47 = vpop.f32.mrf.mxu2  ;;  %v202_v48 = vadd.f32 %v188_v44, %v166_v45 }
  0x98   :  { %v125_v49 = vadd.f32 %v124_v47, %v56_v26  ;;  %v116_v50 = vpop.f32.mrf.mxu0  ;;  %v121_v52 = vpop.f32.mrf.mxu1 }
  0x99   :  { %205 = vst [vmem:[%s374_s3] sm:$0xff] %v200_v46  ;;  %v117_v51 = vadd.f32 %v116_v50, %v41_v28  ;;  %v122_v54 = vadd.f32 %v121_v52, %v51_v30 }
  0x9a   :  { %207 = vst [vmem:[%s374_s3 + $0x10] sm:$0xff] %v202_v48  ;;  %v132_v53 = vmax.f32 %v125_v49, 0.0 }
  0x9b   :  { %v129_v55 = vmax.f32 %v117_v51, 0.0  ;;  %v131_v57 = vmax.f32 %v122_v54, 0.0 }
  0x9c   :  { %v168_v56 = vmul.f32 %v162_v34, %v132_v53 }
  0x9d   :  { %v165_v59 = vmul.f32 %v147_v31, %v129_v55  ;;  %v167_v61 = vmul.f32 %v157_v32, %v131_v57 }
  0x9e   :  { %v204_v60 = vadd.f32 %v198_v58, %v168_v56 }
  0x9f   :  { %v201_v63 = vadd.f32 %v183_v39, %v165_v59  ;;  %v126_v0 = vpop.f32.mrf.mxu2  ;;  %v203_v1 = vadd.f32 %v193_v62, %v167_v61 }
  0xa0   :  { %209 = vst [vmem:[%s374_s3 + $0x20] sm:$0xff] %v204_v60 }
  0xa1   :  { %206 = vst [vmem:[%s374_s3 + $0x8] sm:$0xff] %v201_v63 }
  0xa2   :  { %208 = vst [vmem:[%s374_s3 + $0x18] sm:$0xff] %v203_v1 }

// kernel: openunmix_forward.15
= control target key start
LH: loop header
LB: loop body
LE: loop exit
PB: predicated region body
PF: predicated region fallthrough
CT: control target
= control target key end

     0   :  { %s500_s12 = smov 0   ;;  %s502_s13 = smov 0   ;;  %s593_s0 = inlined_call_operand.vmem [shape: bf16[24,16], index: 0, kind: input, shape index: {}]   ;;  %s594_s1 = inlined_call_operand.vmem [shape: bf16[16,512], index: 1, kind: input, shape index: {}]   ;;  %s595_s2 = inlined_call_operand.vmem [shape: f32[3,24,1], index: 2, kind: input, shape index: {}]   ;;  %s596_s3 = inlined_call_operand.vmem [shape: f32[24,512], index: 3, kind: output, shape index: {}]  }
   0x1   :  { %s504_s14 = smov 0  }
   0x2 LB: > { %s391_s15 = sadd.s32 4294967295, %s477_s14   ;;  %s517_s16 = sadd.s32 1, %s477_s14   ;;  %s477_s14 = sphi %s504_s14, %s600_s14   ;;  %s473_s13 = sphi %s502_s13, %s599_s13   ;;  %s469_s12 = sphi %s500_s12, %s598_s12  }
   0x3   : > { %s38_s17 = ssub.s32 %s477_s14, %s517_s16  ;;  %s41_s18 = sadd.s32 1, %s473_s13 }
   0x4   : > { %p39_p0 = scmp.eq.s32.totalorder %s38_s17, 0  ;;  %p48_p1 = scmp.ne.s32.totalorder %s473_s13, %s469_s12 }
   0x5   : > { %p49_p2 = scmp.eq.s32.totalorder %s477_s14, 0  ;;  %p99_p3 = scmp.eq.s32.totalorder %s391_s15, 1 }
   0x6   : > { %s528_s19 = scalar_select %p39_p0, %s473_s13, %s41_s18  }
   0x7   : > { %p50_p4 = por %p49_p2, %p48_p1  ;;  %p530_p5 = por %p99_p3, %p48_p1 }
   0x8   : > { %p394_p6 = scmp.ge.s32.totalorder %s477_s14, 2 }
   0xa   : > { %127 = sbr.rel (%p394_p6) target bundleno = 21 (0x15), region = 24 }
   0xf   : > { %130 = sbr.rel (!%p50_p4) target bundleno = 21 (0x15), region = 28  ;;  %s132_s21 = sand.u32 (%p50_p4), 1, %s473_s13  }
  0x10   : > { %s420_s22 = sshll.u32 (%p50_p4), %s477_s14, 3  ;;  %s395_s23 = sshll.u32 (%p50_p4), %s132_s21, 4 }
  0x11   : > { %s137_s26 = scalar_lea.vmem (%p50_p4), %s594_s1, %s420_s22  ;;  %s134_s27 = scalar_lea.vmem (%p50_p4), [#allocation2], %s395_s23 }
  0x12   : > { %v168_v0 = vld [vmem:[%s137_s26] sm:$0xff] (%p50_p4)  ;;  %v170_v1 = vld [vmem:[%s137_s26 + $0x10] sm:$0xff] (%p50_p4) }
  0x13   : > { %169 = vst [vmem:[%s134_s27] sm:$0xff] (%p50_p4), %v168_v0 }
  0x14   : > { %171 = vst [vmem:[%s134_s27 + $0x8] sm:$0xff] %v170_v1 }
  0x15 PF: > { %p398_p7 = scmp.ge.s32.totalorder %s477_s14, 1  ;;  %p176_p8 = scmp.lt.s32.totalorder %s477_s14, 3 }
  0x17   : > { %p177_p9 = pnand %p398_p7, %p176_p8 }
  0x18   : > { %s183_s28 = sand.u32 (!%p177_p9), 1, %s469_s12  }
  0x19   : > { %180 = sbr.rel (%p177_p9) target bundleno = 183 (0xb7), region = 66  ;;  %s399_s4 = sshll.u32 (!%p177_p9), %s183_s28, 4 }
  0x1a   : > { %s185_s9 = scalar_lea.vmem (!%p177_p9), [#allocation2], %s399_s4  ;;  %s427_s21 = smul.u32 (!%p177_p9), 48, %s183_s28 }
  0x1c   : > { %s562_s22 = scalar_lea.vmem (!%p177_p9), [#allocation3], %s427_s21 }
  0x1e   : > { %v210_v2 = vld [vmem:[%s593_s0 + $0x8] sm:$0xf]  ;;  %v479_v4 = vmov 0   ;;  %v213_v5 = vld [vmem:[%s595_s2] sm:$0xff]  ;;  %v215_v6 = vld [vmem:[%s595_s2 + $0x10] sm:$0xff]  ;;  %vm249_vm0 = vcmask 130048  }
  0x1f   : > { %v236_v3 = vunpack.c.l.b16 %v210_v2  ;;  %453 = vset.pattern.permute.xlu0 %v479_v4  ;;  %454 = vset.pattern.permute.xlu1 %v479_v4  ;;  %v406_v7 = vld [vmem:[%s185_s9] sm:$0xf]  ;;  %v423_v8 = vld [vmem:[%s185_s9 + $0x4] sm:$0xf0]  ;;  %v422_v10 = vld [vmem:[%s185_s9 + $0x4] sm:$0xf] }
  0x20   : > { %218 = vperm.xlu0 %453, %v213_v5   ;;  %228 = vperm.xlu1 %454, %v215_v6   ;;  %v407_v9 = vor.u32 %v423_v8, %v406_v7  ;;  %v408_v11 = vld [vmem:[%s185_s9 + $0x8] sm:$0xf0]  ;;  %v421_v13 = vld [vmem:[%s593_s0] sm:$0xff]  ;;  %s424_s12 = sshll.u32 (%p530_p5), %s391_s15, 4 }
  0x21   : > { %v411_v12 = vor.u32 %v422_v10, %v408_v11  ;;  %v238_v14 = vpack.c.b16 %v236_v3, %v236_v3  ;;  %v214_v15 = vld [vmem:[%s595_s2 + $0x8] sm:$0xff]  ;;  %s307_s25 = scalar_lea.vmem (%p530_p5), %s596_s3, %s424_s12 }
  0x22   : > { %263 = vmatpush.bf16.msra.mxu0 %v407_v9  ;;  %425 = vmatpush.bf16.msra.mxu2 %v407_v9 }
  0x23   : > { %281 = vmatpush.bf16.msra.mxu1 %v411_v12  ;;  %426 = vmatpush.bf16.msra.mxu3 %v411_v12 }
  0x25   : > { %412 = vmatmul.msk.bf16.vlgmr.msra.gmra.mxu0 %vm249_vm0, %v421_v13  ;;  %413 = vmatmul.msk.bf16.vlgmr.msra.gmra.mxu2 %vm249_vm0, %v238_v14 }
  0x26   : > { %414 = vmatmul.msk.bf16.vlgmr.msra.gmra.mxu1 %vm249_vm0, %v421_v13  ;;  %415 = vmatmul.msk.bf16.vlgmr.msra.gmra.mxu3 %vm249_vm0, %v238_v14 }
  0x28   : > { %223 = vperm.xlu0 %453, %v214_v15  }
  0x92   : > { %v219_v16 = vpop.permute.xlu0 %218  ;;  %v229_v21 = vpop.permute.xlu1 %228 }
  0x9a   : > { %v224_v25 = vpop.permute.xlu0 %223 }
  0xa2   : > { %v265_v17 = vpop.f32.mrf.mxu0 }
  0xa3   : > { %v266_v18 = vadd.f32 %v265_v17, %v219_v16  ;;  %v283_v19 = vpop.f32.mrf.mxu1 }
  0xa4   : > { %v284_v20 = vadd.f32 %v283_v19, %v219_v16 }
  0xa5   : > { %292 = vst [vmem:[%s562_s22] sm:$0xff] %v266_v18 }
  0xa6   : > { %293 = vst [vmem:[%s562_s22 + $0x8] sm:$0xff] %v284_v20 }
  0xa8   : > { %v270_v22 = vpop.f32.mrf.mxu2 }
  0xa9   : > { %v271_v23 = vadd.f32 %v270_v22, %v229_v21  ;;  %v288_v24 = vpop.f32.mrf.mxu3 }
  0xaa   : > { %v289_v26 = vadd.f32 %v288_v24, %v229_v21  ;;  %v267_v27 = vpop.f32.mrf.mxu0 }
  0xab   : > { %296 = vst [vmem:[%s562_s22 + $0x20] sm:$0xff] %v271_v23  ;;  %v268_v28 = vadd.f32 %v267_v27, %v224_v25  ;;  %v285_v29 = vpop.f32.mrf.mxu1 }
  0xac   : > { %297 = vst [vmem:[%s562_s22 + $0x28] sm:$0xff] %v289_v26  ;;  %v286_v30 = vadd.f32 %v285_v29, %v224_v25  ;;  %v320_v33 = vld [vmem:[%s562_s22] sm:$0xff] (%p530_p5) }
  0xad   : > { %294 = vst [vmem:[%s562_s22 + $0x10] sm:$0xff] %v268_v28  ;;  %304 = sbr.rel (!%p530_p5) target bundleno = 183 (0xb7), region = 74  ;;  %v322_v34 = vld [vmem:[%s562_s22 + $0x8] sm:$0xff] (%p530_p5) }
  0xae   : > { %295 = vst [vmem:[%s562_s22 + $0x18] sm:$0xff] %v286_v30 }
  0xaf   : > { %321 = vst [vmem:[%s307_s25] sm:$0xff] (%p530_p5), %v320_v33 }
  0xb0   : > { %v272_v31 = vpop.f32.mrf.mxu2  ;;  %323 = vst [vmem:[%s307_s25 + $0x8] sm:$0xff] (%p530_p5), %v322_v34 }
  0xb1   : > { %v290_v32 = vpop.f32.mrf.mxu3 }
  0xb2   : > { %v328_v37 = vld [vmem:[%s562_s22 + $0x20] sm:$0xff] }
  0xb3   : > { %v330_v38 = vld [vmem:[%s562_s22 + $0x28] sm:$0xff]  ;;  %329 = vst [vmem:[%s307_s25 + $0x40] sm:$0xff] %v328_v37 }
  0xb4   : > { %v324_v35 = vld [vmem:[%s562_s22 + $0x10] sm:$0xff]  ;;  %331 = vst [vmem:[%s307_s25 + $0x48] sm:$0xff] %v330_v38 }
  0xb5   : > { %v326_v36 = vld [vmem:[%s562_s22 + $0x18] sm:$0xff]  ;;  %325 = vst [vmem:[%s307_s25 + $0x20] sm:$0xff] %v324_v35 }
  0xb6   : > { %327 = vst [vmem:[%s307_s25 + $0x28] sm:$0xff] %v326_v36 }
  0xb7 PF: > { %p10_p10 = scmp.ge.s32.totalorder %s517_s16, 4   ;;  %s598_s12 = smov %s473_s13 }
  0xb8   : > { %s599_s13 = smov %s528_s19  ;;  %s600_s14 = smov %s517_s16 }
  0xb9   :  { %12 = sbr.rel (!%p10_p10) target bundleno = 2 (0x2), region = 128 }

</bundles_post_ra>
